<compile_context>
chip_gen: v5e
topology: v5e:2x2
jax: 0.10.0
libtpu: 0.0.40
codegen_flags: <defaults>
</compile_context>

<pallas_src>
import jax
import jax.numpy as jnp
from jax import lax
from jax.experimental import pallas as pl
from jax.experimental.pallas import tpu as pltpu

# ----------------------------- sizes -----------------------------
B = 2          # batch
L = 8          # src length
LL = 3         # label window length (seq_attack uses a 3-token window)
E = 32         # embedding dim (victim_model.src_embed.embedding_dim)
D = 32         # d_model
A = 2          # action_dim
V = 50         # vocab size
PAD_ID, BOS_ID = 1, 2
LN_EPS = 1e-5
LEAKY_SLOPE = 0.01
OUT_LANES = 128   # lane-padded fused output: lanes [0,A) = dist, lane A = value


def _agent_kernel(src_ref, lab_ref, len_ref,
                  wgru_ref, bgru_ref, wfeat_ref, wheads_ref, bmisc_ref,
                  out_ref):
    f32 = jnp.float32

    # ---- one-time loads of the packed weight slabs (hoisted out of the loop) ----
    wgru = wgru_ref[...]                      # [2E+2D, 3D] rows: wi_f | wi_b | wh_f | wh_b
    wi_f = wgru[0:E, :]
    wi_b = wgru[E:2 * E, :]
    wh_f = wgru[2 * E:2 * E + D, :]
    wh_b = wgru[2 * E + D:2 * E + 2 * D, :]
    bgru = bgru_ref[...]                      # [4, 3D] rows: bgi_f | bgi_b | bhn_f | bhn_b
    b_gi_f = bgru[0:1, :]
    b_gi_b = bgru[1:2, :]
    b_hn_f = bgru[2:3, 0:D]
    b_hn_b = bgru[3:4, 0:D]

    # ---- batched input-side GRU projections (removed from the h->h chain) ----
    src_flat = src_ref[...]                                                    # [L*B, E] time-major
    gi_f_all = jnp.dot(src_flat, wi_f, preferred_element_type=f32) + b_gi_f    # [L*B, 3D]
    gi_b_all = jnp.dot(src_flat, wi_b, preferred_element_type=f32) + b_gi_b    # [L*B, 3D]

    # ---- validity mask from lengths (broadcast hoisted; per-step is one VPU cmp) ----
    len_bd = jnp.broadcast_to(len_ref[...], (B, D))                            # [B, D]

    zeros = jnp.zeros((B, D), f32)
    h_f, h_b, acc_f, acc_b = zeros, zeros, zeros, zeros

    # ---- fused, fully-unrolled bidirectional recurrence; state stays in vregs ----
    for t in range(L):
        tb = L - 1 - t
        m_f = (len_bd > t).astype(f32)          # valid iff t  < length (packed fwd)
        m_b = (len_bd > tb).astype(f32)         # valid iff tb < length (packed bwd)
        gi_f = gi_f_all[t * B:(t + 1) * B, :]   # [B, 3D] static slice
        gi_b = gi_b_all[tb * B:(tb + 1) * B, :]

        gh_f = jnp.dot(h_f, wh_f, preferred_element_type=f32)   # [B, 3D]
        gh_b = jnp.dot(h_b, wh_b, preferred_element_type=f32)

        # forward direction (gate order r, z, n; b_ih and b_hh{r,z} folded into gi)
        r_f = jax.nn.sigmoid(gi_f[:, 0:D] + gh_f[:, 0:D])
        z_f = jax.nn.sigmoid(gi_f[:, D:2 * D] + gh_f[:, D:2 * D])
        n_f = jnp.tanh(gi_f[:, 2 * D:3 * D] + r_f * (gh_f[:, 2 * D:3 * D] + b_hn_f))
        hc_f = (1.0 - z_f) * n_f + z_f * h_f
        h_f = m_f * hc_f + (1.0 - m_f) * h_f
        acc_f = acc_f + m_f * hc_f

        # backward direction (state stays zero over trailing pads)
        r_b = jax.nn.sigmoid(gi_b[:, 0:D] + gh_b[:, 0:D])
        z_b = jax.nn.sigmoid(gi_b[:, D:2 * D] + gh_b[:, D:2 * D])
        n_b = jnp.tanh(gi_b[:, 2 * D:3 * D] + r_b * (gh_b[:, 2 * D:3 * D] + b_hn_b))
        hc_b = (1.0 - z_b) * n_b + z_b * h_b
        h_b = m_b * hc_b + (1.0 - m_b) * h_b
        acc_b = acc_b + m_b * hc_b

    # ---- masked mean over time ----
    inv_len = pl.reciprocal(len_bd, approx=True)   # EUP slot
    ctx_f = acc_f * inv_len
    ctx_b = acc_b * inv_len

    # ---- feature projection (ctx_linear split fwd/bwd + input_linear) + LayerNorm ----
    wfeat = wfeat_ref[...]                    # [2D+E, D] rows: wctx_f | wctx_b | w_in
    bmisc = bmisc_ref[...]                    # [5, 128] rows: b_feat | gamma | beta | b_h1 | b_2
    b_feat = bmisc[0:1, 0:D]                  # bin + bctx (folded in wrapper)
    gamma = bmisc[1:2, 0:D]
    beta = bmisc[2:3, 0:D]

    feat = (jnp.dot(ctx_f, wfeat[0:D, :], preferred_element_type=f32)
            + jnp.dot(ctx_b, wfeat[D:2 * D, :], preferred_element_type=f32)
            + jnp.dot(lab_ref[...], wfeat[2 * D:2 * D + E, :], preferred_element_type=f32)
            + b_feat)
    mu = jnp.mean(feat, axis=-1, keepdims=True)
    var = jnp.mean((feat - mu) ** 2, axis=-1, keepdims=True)
    feat = (feat - mu) * lax.rsqrt(var + LN_EPS) * gamma + beta

    # ---- attacker + critic heads fused: one hidden matmul, one block-diag matmul ----
    wheads = wheads_ref[...]                  # [3D, 128]
    w_h1 = wheads[0:D, 0:2 * D]               # [D, 2D]: attacker | critic first layers
    w_2 = wheads[D:3 * D, :]                  # [2D, 128]: block-diagonal second layers
    b_h1 = bmisc[3:4, 0:2 * D]
    b_2 = bmisc[4:5, :]

    h1 = jnp.dot(feat, w_h1, preferred_element_type=f32) + b_h1       # [B, 2D]
    h1 = jnp.where(h1 >= 0.0, h1, LEAKY_SLOPE * h1)                   # LeakyReLU
    out_all = jnp.dot(h1, w_2, preferred_element_type=f32) + b_2      # [B, 128]

    # softmax over the first A lanes (the global `out - out.max()` shift is a
    # no-op for softmax, so only the row-max stabilization is kept); value
    # (critic) sits in lane A of the same lane-dense output slab.
    lane = lax.broadcasted_iota(jnp.int32, (B, OUT_LANES), 1)
    is_dist = lane < A
    logits = jnp.where(is_dist, out_all, f32(-1e30))
    mx = jnp.max(logits, axis=-1, keepdims=True)
    e = jnp.exp(logits - mx)
    probs = e / jnp.sum(e, axis=-1, keepdims=True)
    out_ref[...] = jnp.where(is_dist, probs, jnp.where(lane == A, out_all, 0.0))


def init_params(key):
    ks = jax.random.split(key, 24)

    def w(k, shape, scale=0.1):
        return (scale * jax.random.normal(k, shape)).astype(jnp.float32)

    emb = w(ks[0], (V, E))
    emb = emb.at[PAD_ID].set(0.0)                       # padding_idx row is zero

    params = dict(
        emb_table=emb,
        # GRU weights: [in, 3*hidden], gate order (r, z, n)
        wif=w(ks[1], (E, 3 * D)), whf=w(ks[2], (D, 3 * D)),
        bif=w(ks[3], (1, 3 * D)), bhf=w(ks[4], (1, 3 * D)),
        wib=w(ks[5], (E, 3 * D)), whb=w(ks[6], (D, 3 * D)),
        bib=w(ks[7], (1, 3 * D)), bhb=w(ks[8], (1, 3 * D)),
        # ctx_linear(2D -> D) split into fwd/bwd halves
        wctxf=w(ks[9], (D, D)), wctxb=w(ks[10], (D, D)), bctx=w(ks[11], (1, D)),
        win=w(ks[12], (E, D)), bin=w(ks[13], (1, D)),
        gamma=jnp.ones((1, D), jnp.float32), beta=jnp.zeros((1, D), jnp.float32),
        wa1=w(ks[14], (D, D)), ba1=w(ks[15], (1, D)),
        wa2=w(ks[16], (D, A)), ba2=w(ks[17], (1, A)),
        wc1=w(ks[18], (D, D)), bc1=w(ks[19], (1, D)),
        wc2=w(ks[20], (D, 1)), bc2=w(ks[21], (1, 1)),
    )
    return params


@jax.jit
def agent_forward(params, src, src_mask, src_length, label):
    """src: [B, L] int32, src_mask: [B, 1, L] bool, src_length: [B] int32, label: [B, LL] int32.

    src_mask is the standard padding mask (pos < length); the kernel regenerates
    it from src_length, so the mask tensor itself is not shipped to the kernel.
    """
    del src_mask
    f32 = jnp.float32
    scale = jnp.sqrt(f32(E))                            # Embeddings with scale=True
    emb = params["emb_table"]
    src_emb = emb[src] * scale                          # [B, L, E] (glue: gather)
    label_emb_sum = (emb[label] * scale).sum(axis=1)    # [B, E]

    # layout: time-major, flattened activations so the kernel can batch the
    # input-side GRU projection as a single matmul per direction.
    src_flat = jnp.transpose(src_emb, (1, 0, 2)).reshape(L * B, E).astype(f32)  # [L*B, E]
    length = src_length.astype(f32)[:, None]                                    # [B, 1]

    # ---- pack the ~23 weights/biases into 5 contiguous slabs (few DMAs) ----
    p = params
    # fold b_ih fully + b_hh for the r,z gates into the precomputed gi bias
    gate_rz = jnp.concatenate([jnp.ones((1, 2 * D), f32), jnp.zeros((1, D), f32)], axis=1)
    b_gi_f = p["bif"] + p["bhf"] * gate_rz
    b_gi_b = p["bib"] + p["bhb"] * gate_rz
    b_hn_f = jnp.pad(p["bhf"][:, 2 * D:], ((0, 0), (0, 2 * D)))   # pad to 3D lanes
    b_hn_b = jnp.pad(p["bhb"][:, 2 * D:], ((0, 0), (0, 2 * D)))

    w_gru = jnp.concatenate([p["wif"], p["wib"], p["whf"], p["whb"]], axis=0)   # [2E+2D, 3D]
    b_gru = jnp.concatenate([b_gi_f, b_gi_b, b_hn_f, b_hn_b], axis=0)           # [4, 3D]
    w_feat = jnp.concatenate([p["wctxf"], p["wctxb"], p["win"]], axis=0)        # [2D+E, D]

    w_h1 = jnp.concatenate([p["wa1"], p["wc1"]], axis=1)                        # [D, 2D]
    b_h1 = jnp.concatenate([p["ba1"], p["bc1"]], axis=1)                        # [1, 2D]
    w_2 = jnp.zeros((2 * D, OUT_LANES), f32)
    w_2 = w_2.at[0:D, 0:A].set(p["wa2"]).at[D:2 * D, A:A + 1].set(p["wc2"])     # block-diag
    b_2 = jnp.zeros((1, OUT_LANES), f32)
    b_2 = b_2.at[:, 0:A].set(p["ba2"]).at[:, A:A + 1].set(p["bc2"])

    def pad_lanes(x):
        return jnp.pad(x, ((0, 0), (0, OUT_LANES - x.shape[1])))

    w_heads = jnp.concatenate([pad_lanes(w_h1), w_2], axis=0)                   # [3D, 128]
    b_misc = jnp.concatenate([pad_lanes(p["bin"] + p["bctx"]),                  # bctx folded
                              pad_lanes(p["gamma"]), pad_lanes(p["beta"]),
                              pad_lanes(b_h1), b_2], axis=0)                    # [5, 128]

    inputs = (src_flat, label_emb_sum.astype(f32), length,
              w_gru, b_gru, w_feat, w_heads, b_misc)

    vmem = pl.BlockSpec(memory_space=pltpu.MemorySpace.VMEM)
    slab = pl.pallas_call(
        _agent_kernel,
        out_shape=jax.ShapeDtypeStruct((B, OUT_LANES), jnp.float32),
        in_specs=[vmem] * len(inputs),
        out_specs=vmem,
    )(*inputs)

    dist = slab[:, :A]            # [B, A]
    value = slab[:, A:A + 1]      # [B, 1]
    return dist, value


if __name__ == "__main__":
    key = jax.random.PRNGKey(0)
    k_param, k_src, k_label = jax.random.split(key, 3)

    params = init_params(k_param)

    # deterministic small inputs (BOS-initial sequences, padded to L)
    src_length = jnp.array([8, 5], dtype=jnp.int32)                 # [B]
    body = jax.random.randint(k_src, (B, L), 4, V, dtype=jnp.int32)
    src = body.at[:, 0].set(BOS_ID)
    pos = jnp.arange(L)[None, :]
    valid = pos < src_length[:, None]
    src = jnp.where(valid, src, PAD_ID)                             # [B, L]
    src_mask = valid[:, None, :]                                    # [B, 1, L] bool
    label = jax.random.randint(k_label, (B, LL), 4, V, dtype=jnp.int32)  # [B, 3]

    dist, value = agent_forward(params, src, src_mask, src_length, label)
    jax.block_until_ready((dist, value))

    assert dist.shape == (B, A) and value.shape == (B, 1)
    assert bool(jnp.all(jnp.isfinite(dist))) and bool(jnp.all(jnp.isfinite(value)))
    assert bool(jnp.allclose(jnp.sum(dist, axis=-1), 1.0, atol=1e-4))
    print("KERNEL_OK")
</pallas_src>

<mosaic_0001>
module attributes {stable_mosaic.version = 11 : i64} {
  func.func @_agent_kernel(%arg0: memref<16x32xf32, #tpu.memory_space<vmem>>, %arg1: memref<2x32xf32, #tpu.memory_space<vmem>>, %arg2: memref<2x1xf32, #tpu.memory_space<vmem>>, %arg3: memref<128x96xf32, #tpu.memory_space<vmem>>, %arg4: memref<4x96xf32, #tpu.memory_space<vmem>>, %arg5: memref<96x32xf32, #tpu.memory_space<vmem>>, %arg6: memref<96x128xf32, #tpu.memory_space<vmem>>, %arg7: memref<5x128xf32, #tpu.memory_space<vmem>>, %arg8: memref<2x128xf32, #tpu.memory_space<vmem>>) attributes {dimension_semantics = [], scalar_prefetch = 0 : i64, scratch_operands = 0 : i64, tpu.core_type = #tpu.core_type<tc>} {
    %c0 = arith.constant 0 : index
    %c0_0 = arith.constant 0 : index
    %0 = vector.load %arg3[%c0, %c0_0] : memref<128x96xf32, #tpu.memory_space<vmem>>, vector<128x96xf32>
    %1 = vector.extract_strided_slice %0 {offsets = [0, 0], sizes = [32, 96], strides = [1, 1]} : vector<128x96xf32> to vector<32x96xf32>
    %2 = vector.extract_strided_slice %0 {offsets = [32, 0], sizes = [32, 96], strides = [1, 1]} : vector<128x96xf32> to vector<32x96xf32>
    %3 = vector.extract_strided_slice %0 {offsets = [64, 0], sizes = [32, 96], strides = [1, 1]} : vector<128x96xf32> to vector<32x96xf32>
    %4 = vector.extract_strided_slice %0 {offsets = [96, 0], sizes = [32, 96], strides = [1, 1]} : vector<128x96xf32> to vector<32x96xf32>
    %c0_1 = arith.constant 0 : index
    %c0_2 = arith.constant 0 : index
    %5 = vector.load %arg4[%c0_1, %c0_2] : memref<4x96xf32, #tpu.memory_space<vmem>>, vector<4x96xf32>
    %6 = vector.extract_strided_slice %5 {offsets = [0, 0], sizes = [1, 96], strides = [1, 1]} : vector<4x96xf32> to vector<1x96xf32>
    %7 = vector.extract_strided_slice %5 {offsets = [1, 0], sizes = [1, 96], strides = [1, 1]} : vector<4x96xf32> to vector<1x96xf32>
    %8 = vector.extract_strided_slice %5 {offsets = [2, 0], sizes = [1, 32], strides = [1, 1]} : vector<4x96xf32> to vector<1x32xf32>
    %9 = vector.extract_strided_slice %5 {offsets = [3, 0], sizes = [1, 32], strides = [1, 1]} : vector<4x96xf32> to vector<1x32xf32>
    %c0_3 = arith.constant 0 : index
    %c0_4 = arith.constant 0 : index
    %10 = vector.load %arg0[%c0_3, %c0_4] : memref<16x32xf32, #tpu.memory_space<vmem>>, vector<16x32xf32>
    %cst = arith.constant dense<0.000000e+00> : vector<16x96xf32>
    %11 = tpu.matmul %10, %1, %cst {dimension_numbers = #tpu.dot_dimension_numbers<[1], [0], [0], [1], [0, 0, 1, 1], [], []>} : vector<16x32xf32>, vector<32x96xf32>, vector<16x96xf32> -> vector<16x96xf32>
    %12 = vector.broadcast %6 : vector<1x96xf32> to vector<16x96xf32>
    %13 = arith.addf %11, %12 : vector<16x96xf32>
    %cst_5 = arith.constant dense<0.000000e+00> : vector<16x96xf32>
    %14 = tpu.matmul %10, %2, %cst_5 {dimension_numbers = #tpu.dot_dimension_numbers<[1], [0], [0], [1], [0, 0, 1, 1], [], []>} : vector<16x32xf32>, vector<32x96xf32>, vector<16x96xf32> -> vector<16x96xf32>
    %15 = vector.broadcast %7 : vector<1x96xf32> to vector<16x96xf32>
    %16 = arith.addf %14, %15 : vector<16x96xf32>
    %c0_6 = arith.constant 0 : index
    %c0_7 = arith.constant 0 : index
    %17 = vector.load %arg2[%c0_6, %c0_7] : memref<2x1xf32, #tpu.memory_space<vmem>>, vector<2x1xf32>
    %18 = vector.shape_cast %17 : vector<2x1xf32> to vector<2x1xf32>
    %19 = vector.broadcast %18 : vector<2x1xf32> to vector<2x32xf32>
    %cst_8 = arith.constant 0.000000e+00 : f32
    %20 = vector.broadcast %cst_8 : f32 to vector<2x32xf32>
    %cst_9 = arith.constant 0.000000e+00 : f32
    %21 = vector.broadcast %cst_9 : f32 to vector<2x32xf32>
    %22 = arith.cmpf ogt, %19, %21 : vector<2x32xf32>
    %23 = arith.extui %22 : vector<2x32xi1> to vector<2x32xi32>
    %24 = arith.sitofp %23 : vector<2x32xi32> to vector<2x32xf32>
    %cst_10 = arith.constant 7.000000e+00 : f32
    %25 = vector.broadcast %cst_10 : f32 to vector<2x32xf32>
    %26 = arith.cmpf ogt, %19, %25 : vector<2x32xf32>
    %27 = arith.extui %26 : vector<2x32xi1> to vector<2x32xi32>
    %28 = arith.sitofp %27 : vector<2x32xi32> to vector<2x32xf32>
    %29 = vector.extract_strided_slice %13 {offsets = [0, 0], sizes = [2, 96], strides = [1, 1]} : vector<16x96xf32> to vector<2x96xf32>
    %30 = vector.extract_strided_slice %16 {offsets = [14, 0], sizes = [2, 96], strides = [1, 1]} : vector<16x96xf32> to vector<2x96xf32>
    %cst_11 = arith.constant dense<0.000000e+00> : vector<2x96xf32>
    %31 = tpu.matmul %20, %3, %cst_11 {dimension_numbers = #tpu.dot_dimension_numbers<[1], [0], [0], [1], [0, 0, 1, 1], [], []>} : vector<2x32xf32>, vector<32x96xf32>, vector<2x96xf32> -> vector<2x96xf32>
    %cst_12 = arith.constant dense<0.000000e+00> : vector<2x96xf32>
    %32 = tpu.matmul %20, %4, %cst_12 {dimension_numbers = #tpu.dot_dimension_numbers<[1], [0], [0], [1], [0, 0, 1, 1], [], []>} : vector<2x32xf32>, vector<32x96xf32>, vector<2x96xf32> -> vector<2x96xf32>
    %33 = vector.extract_strided_slice %29 {offsets = [0, 0], sizes = [2, 32], strides = [1, 1]} : vector<2x96xf32> to vector<2x32xf32>
    %34 = vector.extract_strided_slice %31 {offsets = [0, 0], sizes = [2, 32], strides = [1, 1]} : vector<2x96xf32> to vector<2x32xf32>
    %35 = arith.addf %33, %34 : vector<2x32xf32>
    %36 = arith.negf %35 : vector<2x32xf32>
    %37 = math.exp %36 : vector<2x32xf32>
    %cst_13 = arith.constant 1.000000e+00 : f32
    %38 = vector.broadcast %cst_13 : f32 to vector<2x32xf32>
    %39 = arith.addf %38, %37 : vector<2x32xf32>
    %40 = arith.divf %38, %39 : vector<2x32xf32>
    %41 = vector.extract_strided_slice %29 {offsets = [0, 32], sizes = [2, 32], strides = [1, 1]} : vector<2x96xf32> to vector<2x32xf32>
    %42 = vector.extract_strided_slice %31 {offsets = [0, 32], sizes = [2, 32], strides = [1, 1]} : vector<2x96xf32> to vector<2x32xf32>
    %43 = arith.addf %41, %42 : vector<2x32xf32>
    %44 = arith.negf %43 : vector<2x32xf32>
    %45 = math.exp %44 : vector<2x32xf32>
    %cst_14 = arith.constant 1.000000e+00 : f32
    %46 = vector.broadcast %cst_14 : f32 to vector<2x32xf32>
    %47 = arith.addf %46, %45 : vector<2x32xf32>
    %48 = arith.divf %46, %47 : vector<2x32xf32>
    %49 = vector.extract_strided_slice %29 {offsets = [0, 64], sizes = [2, 32], strides = [1, 1]} : vector<2x96xf32> to vector<2x32xf32>
    %50 = vector.extract_strided_slice %31 {offsets = [0, 64], sizes = [2, 32], strides = [1, 1]} : vector<2x96xf32> to vector<2x32xf32>
    %51 = vector.broadcast %8 : vector<1x32xf32> to vector<2x32xf32>
    %52 = arith.addf %50, %51 : vector<2x32xf32>
    %53 = arith.mulf %40, %52 : vector<2x32xf32>
    %54 = arith.addf %49, %53 : vector<2x32xf32>
    %55 = math.tanh %54 : vector<2x32xf32>
    %cst_15 = arith.constant 1.000000e+00 : f32
    %56 = vector.broadcast %cst_15 : f32 to vector<2x32xf32>
    %57 = arith.subf %56, %48 : vector<2x32xf32>
    %58 = arith.mulf %57, %55 : vector<2x32xf32>
    %59 = arith.mulf %48, %20 : vector<2x32xf32>
    %60 = arith.addf %58, %59 : vector<2x32xf32>
    %61 = arith.mulf %24, %60 : vector<2x32xf32>
    %cst_16 = arith.constant 1.000000e+00 : f32
    %62 = vector.broadcast %cst_16 : f32 to vector<2x32xf32>
    %63 = arith.subf %62, %24 : vector<2x32xf32>
    %64 = arith.mulf %63, %20 : vector<2x32xf32>
    %65 = arith.addf %61, %64 : vector<2x32xf32>
    %66 = arith.mulf %24, %60 : vector<2x32xf32>
    %67 = arith.addf %20, %66 : vector<2x32xf32>
    %68 = vector.extract_strided_slice %30 {offsets = [0, 0], sizes = [2, 32], strides = [1, 1]} : vector<2x96xf32> to vector<2x32xf32>
    %69 = vector.extract_strided_slice %32 {offsets = [0, 0], sizes = [2, 32], strides = [1, 1]} : vector<2x96xf32> to vector<2x32xf32>
    %70 = arith.addf %68, %69 : vector<2x32xf32>
    %71 = arith.negf %70 : vector<2x32xf32>
    %72 = math.exp %71 : vector<2x32xf32>
    %cst_17 = arith.constant 1.000000e+00 : f32
    %73 = vector.broadcast %cst_17 : f32 to vector<2x32xf32>
    %74 = arith.addf %73, %72 : vector<2x32xf32>
    %75 = arith.divf %73, %74 : vector<2x32xf32>
    %76 = vector.extract_strided_slice %30 {offsets = [0, 32], sizes = [2, 32], strides = [1, 1]} : vector<2x96xf32> to vector<2x32xf32>
    %77 = vector.extract_strided_slice %32 {offsets = [0, 32], sizes = [2, 32], strides = [1, 1]} : vector<2x96xf32> to vector<2x32xf32>
    %78 = arith.addf %76, %77 : vector<2x32xf32>
    %79 = arith.negf %78 : vector<2x32xf32>
    %80 = math.exp %79 : vector<2x32xf32>
    %cst_18 = arith.constant 1.000000e+00 : f32
    %81 = vector.broadcast %cst_18 : f32 to vector<2x32xf32>
    %82 = arith.addf %81, %80 : vector<2x32xf32>
    %83 = arith.divf %81, %82 : vector<2x32xf32>
    %84 = vector.extract_strided_slice %30 {offsets = [0, 64], sizes = [2, 32], strides = [1, 1]} : vector<2x96xf32> to vector<2x32xf32>
    %85 = vector.extract_strided_slice %32 {offsets = [0, 64], sizes = [2, 32], strides = [1, 1]} : vector<2x96xf32> to vector<2x32xf32>
    %86 = vector.broadcast %9 : vector<1x32xf32> to vector<2x32xf32>
    %87 = arith.addf %85, %86 : vector<2x32xf32>
    %88 = arith.mulf %75, %87 : vector<2x32xf32>
    %89 = arith.addf %84, %88 : vector<2x32xf32>
    %90 = math.tanh %89 : vector<2x32xf32>
    %cst_19 = arith.constant 1.000000e+00 : f32
    %91 = vector.broadcast %cst_19 : f32 to vector<2x32xf32>
    %92 = arith.subf %91, %83 : vector<2x32xf32>
    %93 = arith.mulf %92, %90 : vector<2x32xf32>
    %94 = arith.mulf %83, %20 : vector<2x32xf32>
    %95 = arith.addf %93, %94 : vector<2x32xf32>
    %96 = arith.mulf %28, %95 : vector<2x32xf32>
    %cst_20 = arith.constant 1.000000e+00 : f32
    %97 = vector.broadcast %cst_20 : f32 to vector<2x32xf32>
    %98 = arith.subf %97, %28 : vector<2x32xf32>
    %99 = arith.mulf %98, %20 : vector<2x32xf32>
    %100 = arith.addf %96, %99 : vector<2x32xf32>
    %101 = arith.mulf %28, %95 : vector<2x32xf32>
    %102 = arith.addf %20, %101 : vector<2x32xf32>
    %cst_21 = arith.constant 1.000000e+00 : f32
    %103 = vector.broadcast %cst_21 : f32 to vector<2x32xf32>
    %104 = arith.cmpf ogt, %19, %103 : vector<2x32xf32>
    %105 = arith.extui %104 : vector<2x32xi1> to vector<2x32xi32>
    %106 = arith.sitofp %105 : vector<2x32xi32> to vector<2x32xf32>
    %cst_22 = arith.constant 6.000000e+00 : f32
    %107 = vector.broadcast %cst_22 : f32 to vector<2x32xf32>
    %108 = arith.cmpf ogt, %19, %107 : vector<2x32xf32>
    %109 = arith.extui %108 : vector<2x32xi1> to vector<2x32xi32>
    %110 = arith.sitofp %109 : vector<2x32xi32> to vector<2x32xf32>
    %111 = vector.extract_strided_slice %13 {offsets = [2, 0], sizes = [2, 96], strides = [1, 1]} : vector<16x96xf32> to vector<2x96xf32>
    %112 = vector.extract_strided_slice %16 {offsets = [12, 0], sizes = [2, 96], strides = [1, 1]} : vector<16x96xf32> to vector<2x96xf32>
    %cst_23 = arith.constant dense<0.000000e+00> : vector<2x96xf32>
    %113 = tpu.matmul %65, %3, %cst_23 {dimension_numbers = #tpu.dot_dimension_numbers<[1], [0], [0], [1], [0, 0, 1, 1], [], []>} : vector<2x32xf32>, vector<32x96xf32>, vector<2x96xf32> -> vector<2x96xf32>
    %cst_24 = arith.constant dense<0.000000e+00> : vector<2x96xf32>
    %114 = tpu.matmul %100, %4, %cst_24 {dimension_numbers = #tpu.dot_dimension_numbers<[1], [0], [0], [1], [0, 0, 1, 1], [], []>} : vector<2x32xf32>, vector<32x96xf32>, vector<2x96xf32> -> vector<2x96xf32>
    %115 = vector.extract_strided_slice %111 {offsets = [0, 0], sizes = [2, 32], strides = [1, 1]} : vector<2x96xf32> to vector<2x32xf32>
    %116 = vector.extract_strided_slice %113 {offsets = [0, 0], sizes = [2, 32], strides = [1, 1]} : vector<2x96xf32> to vector<2x32xf32>
    %117 = arith.addf %115, %116 : vector<2x32xf32>
    %118 = arith.negf %117 : vector<2x32xf32>
    %119 = math.exp %118 : vector<2x32xf32>
    %cst_25 = arith.constant 1.000000e+00 : f32
    %120 = vector.broadcast %cst_25 : f32 to vector<2x32xf32>
    %121 = arith.addf %120, %119 : vector<2x32xf32>
    %122 = arith.divf %120, %121 : vector<2x32xf32>
    %123 = vector.extract_strided_slice %111 {offsets = [0, 32], sizes = [2, 32], strides = [1, 1]} : vector<2x96xf32> to vector<2x32xf32>
    %124 = vector.extract_strided_slice %113 {offsets = [0, 32], sizes = [2, 32], strides = [1, 1]} : vector<2x96xf32> to vector<2x32xf32>
    %125 = arith.addf %123, %124 : vector<2x32xf32>
    %126 = arith.negf %125 : vector<2x32xf32>
    %127 = math.exp %126 : vector<2x32xf32>
    %cst_26 = arith.constant 1.000000e+00 : f32
    %128 = vector.broadcast %cst_26 : f32 to vector<2x32xf32>
    %129 = arith.addf %128, %127 : vector<2x32xf32>
    %130 = arith.divf %128, %129 : vector<2x32xf32>
    %131 = vector.extract_strided_slice %111 {offsets = [0, 64], sizes = [2, 32], strides = [1, 1]} : vector<2x96xf32> to vector<2x32xf32>
    %132 = vector.extract_strided_slice %113 {offsets = [0, 64], sizes = [2, 32], strides = [1, 1]} : vector<2x96xf32> to vector<2x32xf32>
    %133 = vector.broadcast %8 : vector<1x32xf32> to vector<2x32xf32>
    %134 = arith.addf %132, %133 : vector<2x32xf32>
    %135 = arith.mulf %122, %134 : vector<2x32xf32>
    %136 = arith.addf %131, %135 : vector<2x32xf32>
    %137 = math.tanh %136 : vector<2x32xf32>
    %cst_27 = arith.constant 1.000000e+00 : f32
    %138 = vector.broadcast %cst_27 : f32 to vector<2x32xf32>
    %139 = arith.subf %138, %130 : vector<2x32xf32>
    %140 = arith.mulf %139, %137 : vector<2x32xf32>
    %141 = arith.mulf %130, %65 : vector<2x32xf32>
    %142 = arith.addf %140, %141 : vector<2x32xf32>
    %143 = arith.mulf %106, %142 : vector<2x32xf32>
    %cst_28 = arith.constant 1.000000e+00 : f32
    %144 = vector.broadcast %cst_28 : f32 to vector<2x32xf32>
    %145 = arith.subf %144, %106 : vector<2x32xf32>
    %146 = arith.mulf %145, %65 : vector<2x32xf32>
    %147 = arith.addf %143, %146 : vector<2x32xf32>
    %148 = arith.mulf %106, %142 : vector<2x32xf32>
    %149 = arith.addf %67, %148 : vector<2x32xf32>
    %150 = vector.extract_strided_slice %112 {offsets = [0, 0], sizes = [2, 32], strides = [1, 1]} : vector<2x96xf32> to vector<2x32xf32>
    %151 = vector.extract_strided_slice %114 {offsets = [0, 0], sizes = [2, 32], strides = [1, 1]} : vector<2x96xf32> to vector<2x32xf32>
    %152 = arith.addf %150, %151 : vector<2x32xf32>
    %153 = arith.negf %152 : vector<2x32xf32>
    %154 = math.exp %153 : vector<2x32xf32>
    %cst_29 = arith.constant 1.000000e+00 : f32
    %155 = vector.broadcast %cst_29 : f32 to vector<2x32xf32>
    %156 = arith.addf %155, %154 : vector<2x32xf32>
    %157 = arith.divf %155, %156 : vector<2x32xf32>
    %158 = vector.extract_strided_slice %112 {offsets = [0, 32], sizes = [2, 32], strides = [1, 1]} : vector<2x96xf32> to vector<2x32xf32>
    %159 = vector.extract_strided_slice %114 {offsets = [0, 32], sizes = [2, 32], strides = [1, 1]} : vector<2x96xf32> to vector<2x32xf32>
    %160 = arith.addf %158, %159 : vector<2x32xf32>
    %161 = arith.negf %160 : vector<2x32xf32>
    %162 = math.exp %161 : vector<2x32xf32>
    %cst_30 = arith.constant 1.000000e+00 : f32
    %163 = vector.broadcast %cst_30 : f32 to vector<2x32xf32>
    %164 = arith.addf %163, %162 : vector<2x32xf32>
    %165 = arith.divf %163, %164 : vector<2x32xf32>
    %166 = vector.extract_strided_slice %112 {offsets = [0, 64], sizes = [2, 32], strides = [1, 1]} : vector<2x96xf32> to vector<2x32xf32>
    %167 = vector.extract_strided_slice %114 {offsets = [0, 64], sizes = [2, 32], strides = [1, 1]} : vector<2x96xf32> to vector<2x32xf32>
    %168 = vector.broadcast %9 : vector<1x32xf32> to vector<2x32xf32>
    %169 = arith.addf %167, %168 : vector<2x32xf32>
    %170 = arith.mulf %157, %169 : vector<2x32xf32>
    %171 = arith.addf %166, %170 : vector<2x32xf32>
    %172 = math.tanh %171 : vector<2x32xf32>
    %cst_31 = arith.constant 1.000000e+00 : f32
    %173 = vector.broadcast %cst_31 : f32 to vector<2x32xf32>
    %174 = arith.subf %173, %165 : vector<2x32xf32>
    %175 = arith.mulf %174, %172 : vector<2x32xf32>
    %176 = arith.mulf %165, %100 : vector<2x32xf32>
    %177 = arith.addf %175, %176 : vector<2x32xf32>
    %178 = arith.mulf %110, %177 : vector<2x32xf32>
    %cst_32 = arith.constant 1.000000e+00 : f32
    %179 = vector.broadcast %cst_32 : f32 to vector<2x32xf32>
    %180 = arith.subf %179, %110 : vector<2x32xf32>
    %181 = arith.mulf %180, %100 : vector<2x32xf32>
    %182 = arith.addf %178, %181 : vector<2x32xf32>
    %183 = arith.mulf %110, %177 : vector<2x32xf32>
    %184 = arith.addf %102, %183 : vector<2x32xf32>
    %cst_33 = arith.constant 2.000000e+00 : f32
    %185 = vector.broadcast %cst_33 : f32 to vector<2x32xf32>
    %186 = arith.cmpf ogt, %19, %185 : vector<2x32xf32>
    %187 = arith.extui %186 : vector<2x32xi1> to vector<2x32xi32>
    %188 = arith.sitofp %187 : vector<2x32xi32> to vector<2x32xf32>
    %cst_34 = arith.constant 5.000000e+00 : f32
    %189 = vector.broadcast %cst_34 : f32 to vector<2x32xf32>
    %190 = arith.cmpf ogt, %19, %189 : vector<2x32xf32>
    %191 = arith.extui %190 : vector<2x32xi1> to vector<2x32xi32>
    %192 = arith.sitofp %191 : vector<2x32xi32> to vector<2x32xf32>
    %193 = vector.extract_strided_slice %13 {offsets = [4, 0], sizes = [2, 96], strides = [1, 1]} : vector<16x96xf32> to vector<2x96xf32>
    %194 = vector.extract_strided_slice %16 {offsets = [10, 0], sizes = [2, 96], strides = [1, 1]} : vector<16x96xf32> to vector<2x96xf32>
    %cst_35 = arith.constant dense<0.000000e+00> : vector<2x96xf32>
    %195 = tpu.matmul %147, %3, %cst_35 {dimension_numbers = #tpu.dot_dimension_numbers<[1], [0], [0], [1], [0, 0, 1, 1], [], []>} : vector<2x32xf32>, vector<32x96xf32>, vector<2x96xf32> -> vector<2x96xf32>
    %cst_36 = arith.constant dense<0.000000e+00> : vector<2x96xf32>
    %196 = tpu.matmul %182, %4, %cst_36 {dimension_numbers = #tpu.dot_dimension_numbers<[1], [0], [0], [1], [0, 0, 1, 1], [], []>} : vector<2x32xf32>, vector<32x96xf32>, vector<2x96xf32> -> vector<2x96xf32>
    %197 = vector.extract_strided_slice %193 {offsets = [0, 0], sizes = [2, 32], strides = [1, 1]} : vector<2x96xf32> to vector<2x32xf32>
    %198 = vector.extract_strided_slice %195 {offsets = [0, 0], sizes = [2, 32], strides = [1, 1]} : vector<2x96xf32> to vector<2x32xf32>
    %199 = arith.addf %197, %198 : vector<2x32xf32>
    %200 = arith.negf %199 : vector<2x32xf32>
    %201 = math.exp %200 : vector<2x32xf32>
    %cst_37 = arith.constant 1.000000e+00 : f32
    %202 = vector.broadcast %cst_37 : f32 to vector<2x32xf32>
    %203 = arith.addf %202, %201 : vector<2x32xf32>
    %204 = arith.divf %202, %203 : vector<2x32xf32>
    %205 = vector.extract_strided_slice %193 {offsets = [0, 32], sizes = [2, 32], strides = [1, 1]} : vector<2x96xf32> to vector<2x32xf32>
    %206 = vector.extract_strided_slice %195 {offsets = [0, 32], sizes = [2, 32], strides = [1, 1]} : vector<2x96xf32> to vector<2x32xf32>
    %207 = arith.addf %205, %206 : vector<2x32xf32>
    %208 = arith.negf %207 : vector<2x32xf32>
    %209 = math.exp %208 : vector<2x32xf32>
    %cst_38 = arith.constant 1.000000e+00 : f32
    %210 = vector.broadcast %cst_38 : f32 to vector<2x32xf32>
    %211 = arith.addf %210, %209 : vector<2x32xf32>
    %212 = arith.divf %210, %211 : vector<2x32xf32>
    %213 = vector.extract_strided_slice %193 {offsets = [0, 64], sizes = [2, 32], strides = [1, 1]} : vector<2x96xf32> to vector<2x32xf32>
    %214 = vector.extract_strided_slice %195 {offsets = [0, 64], sizes = [2, 32], strides = [1, 1]} : vector<2x96xf32> to vector<2x32xf32>
    %215 = vector.broadcast %8 : vector<1x32xf32> to vector<2x32xf32>
    %216 = arith.addf %214, %215 : vector<2x32xf32>
    %217 = arith.mulf %204, %216 : vector<2x32xf32>
    %218 = arith.addf %213, %217 : vector<2x32xf32>
    %219 = math.tanh %218 : vector<2x32xf32>
    %cst_39 = arith.constant 1.000000e+00 : f32
    %220 = vector.broadcast %cst_39 : f32 to vector<2x32xf32>
    %221 = arith.subf %220, %212 : vector<2x32xf32>
    %222 = arith.mulf %221, %219 : vector<2x32xf32>
    %223 = arith.mulf %212, %147 : vector<2x32xf32>
    %224 = arith.addf %222, %223 : vector<2x32xf32>
    %225 = arith.mulf %188, %224 : vector<2x32xf32>
    %cst_40 = arith.constant 1.000000e+00 : f32
    %226 = vector.broadcast %cst_40 : f32 to vector<2x32xf32>
    %227 = arith.subf %226, %188 : vector<2x32xf32>
    %228 = arith.mulf %227, %147 : vector<2x32xf32>
    %229 = arith.addf %225, %228 : vector<2x32xf32>
    %230 = arith.mulf %188, %224 : vector<2x32xf32>
    %231 = arith.addf %149, %230 : vector<2x32xf32>
    %232 = vector.extract_strided_slice %194 {offsets = [0, 0], sizes = [2, 32], strides = [1, 1]} : vector<2x96xf32> to vector<2x32xf32>
    %233 = vector.extract_strided_slice %196 {offsets = [0, 0], sizes = [2, 32], strides = [1, 1]} : vector<2x96xf32> to vector<2x32xf32>
    %234 = arith.addf %232, %233 : vector<2x32xf32>
    %235 = arith.negf %234 : vector<2x32xf32>
    %236 = math.exp %235 : vector<2x32xf32>
    %cst_41 = arith.constant 1.000000e+00 : f32
    %237 = vector.broadcast %cst_41 : f32 to vector<2x32xf32>
    %238 = arith.addf %237, %236 : vector<2x32xf32>
    %239 = arith.divf %237, %238 : vector<2x32xf32>
    %240 = vector.extract_strided_slice %194 {offsets = [0, 32], sizes = [2, 32], strides = [1, 1]} : vector<2x96xf32> to vector<2x32xf32>
    %241 = vector.extract_strided_slice %196 {offsets = [0, 32], sizes = [2, 32], strides = [1, 1]} : vector<2x96xf32> to vector<2x32xf32>
    %242 = arith.addf %240, %241 : vector<2x32xf32>
    %243 = arith.negf %242 : vector<2x32xf32>
    %244 = math.exp %243 : vector<2x32xf32>
    %cst_42 = arith.constant 1.000000e+00 : f32
    %245 = vector.broadcast %cst_42 : f32 to vector<2x32xf32>
    %246 = arith.addf %245, %244 : vector<2x32xf32>
    %247 = arith.divf %245, %246 : vector<2x32xf32>
    %248 = vector.extract_strided_slice %194 {offsets = [0, 64], sizes = [2, 32], strides = [1, 1]} : vector<2x96xf32> to vector<2x32xf32>
    %249 = vector.extract_strided_slice %196 {offsets = [0, 64], sizes = [2, 32], strides = [1, 1]} : vector<2x96xf32> to vector<2x32xf32>
    %250 = vector.broadcast %9 : vector<1x32xf32> to vector<2x32xf32>
    %251 = arith.addf %249, %250 : vector<2x32xf32>
    %252 = arith.mulf %239, %251 : vector<2x32xf32>
    %253 = arith.addf %248, %252 : vector<2x32xf32>
    %254 = math.tanh %253 : vector<2x32xf32>
    %cst_43 = arith.constant 1.000000e+00 : f32
    %255 = vector.broadcast %cst_43 : f32 to vector<2x32xf32>
    %256 = arith.subf %255, %247 : vector<2x32xf32>
    %257 = arith.mulf %256, %254 : vector<2x32xf32>
    %258 = arith.mulf %247, %182 : vector<2x32xf32>
    %259 = arith.addf %257, %258 : vector<2x32xf32>
    %260 = arith.mulf %192, %259 : vector<2x32xf32>
    %cst_44 = arith.constant 1.000000e+00 : f32
    %261 = vector.broadcast %cst_44 : f32 to vector<2x32xf32>
    %262 = arith.subf %261, %192 : vector<2x32xf32>
    %263 = arith.mulf %262, %182 : vector<2x32xf32>
    %264 = arith.addf %260, %263 : vector<2x32xf32>
    %265 = arith.mulf %192, %259 : vector<2x32xf32>
    %266 = arith.addf %184, %265 : vector<2x32xf32>
    %cst_45 = arith.constant 3.000000e+00 : f32
    %267 = vector.broadcast %cst_45 : f32 to vector<2x32xf32>
    %268 = arith.cmpf ogt, %19, %267 : vector<2x32xf32>
    %269 = arith.extui %268 : vector<2x32xi1> to vector<2x32xi32>
    %270 = arith.sitofp %269 : vector<2x32xi32> to vector<2x32xf32>
    %cst_46 = arith.constant 4.000000e+00 : f32
    %271 = vector.broadcast %cst_46 : f32 to vector<2x32xf32>
    %272 = arith.cmpf ogt, %19, %271 : vector<2x32xf32>
    %273 = arith.extui %272 : vector<2x32xi1> to vector<2x32xi32>
    %274 = arith.sitofp %273 : vector<2x32xi32> to vector<2x32xf32>
    %275 = vector.extract_strided_slice %13 {offsets = [6, 0], sizes = [2, 96], strides = [1, 1]} : vector<16x96xf32> to vector<2x96xf32>
    %276 = vector.extract_strided_slice %16 {offsets = [8, 0], sizes = [2, 96], strides = [1, 1]} : vector<16x96xf32> to vector<2x96xf32>
    %cst_47 = arith.constant dense<0.000000e+00> : vector<2x96xf32>
    %277 = tpu.matmul %229, %3, %cst_47 {dimension_numbers = #tpu.dot_dimension_numbers<[1], [0], [0], [1], [0, 0, 1, 1], [], []>} : vector<2x32xf32>, vector<32x96xf32>, vector<2x96xf32> -> vector<2x96xf32>
    %cst_48 = arith.constant dense<0.000000e+00> : vector<2x96xf32>
    %278 = tpu.matmul %264, %4, %cst_48 {dimension_numbers = #tpu.dot_dimension_numbers<[1], [0], [0], [1], [0, 0, 1, 1], [], []>} : vector<2x32xf32>, vector<32x96xf32>, vector<2x96xf32> -> vector<2x96xf32>
    %279 = vector.extract_strided_slice %275 {offsets = [0, 0], sizes = [2, 32], strides = [1, 1]} : vector<2x96xf32> to vector<2x32xf32>
    %280 = vector.extract_strided_slice %277 {offsets = [0, 0], sizes = [2, 32], strides = [1, 1]} : vector<2x96xf32> to vector<2x32xf32>
    %281 = arith.addf %279, %280 : vector<2x32xf32>
    %282 = arith.negf %281 : vector<2x32xf32>
    %283 = math.exp %282 : vector<2x32xf32>
    %cst_49 = arith.constant 1.000000e+00 : f32
    %284 = vector.broadcast %cst_49 : f32 to vector<2x32xf32>
    %285 = arith.addf %284, %283 : vector<2x32xf32>
    %286 = arith.divf %284, %285 : vector<2x32xf32>
    %287 = vector.extract_strided_slice %275 {offsets = [0, 32], sizes = [2, 32], strides = [1, 1]} : vector<2x96xf32> to vector<2x32xf32>
    %288 = vector.extract_strided_slice %277 {offsets = [0, 32], sizes = [2, 32], strides = [1, 1]} : vector<2x96xf32> to vector<2x32xf32>
    %289 = arith.addf %287, %288 : vector<2x32xf32>
    %290 = arith.negf %289 : vector<2x32xf32>
    %291 = math.exp %290 : vector<2x32xf32>
    %cst_50 = arith.constant 1.000000e+00 : f32
    %292 = vector.broadcast %cst_50 : f32 to vector<2x32xf32>
    %293 = arith.addf %292, %291 : vector<2x32xf32>
    %294 = arith.divf %292, %293 : vector<2x32xf32>
    %295 = vector.extract_strided_slice %275 {offsets = [0, 64], sizes = [2, 32], strides = [1, 1]} : vector<2x96xf32> to vector<2x32xf32>
    %296 = vector.extract_strided_slice %277 {offsets = [0, 64], sizes = [2, 32], strides = [1, 1]} : vector<2x96xf32> to vector<2x32xf32>
    %297 = vector.broadcast %8 : vector<1x32xf32> to vector<2x32xf32>
    %298 = arith.addf %296, %297 : vector<2x32xf32>
    %299 = arith.mulf %286, %298 : vector<2x32xf32>
    %300 = arith.addf %295, %299 : vector<2x32xf32>
    %301 = math.tanh %300 : vector<2x32xf32>
    %cst_51 = arith.constant 1.000000e+00 : f32
    %302 = vector.broadcast %cst_51 : f32 to vector<2x32xf32>
    %303 = arith.subf %302, %294 : vector<2x32xf32>
    %304 = arith.mulf %303, %301 : vector<2x32xf32>
    %305 = arith.mulf %294, %229 : vector<2x32xf32>
    %306 = arith.addf %304, %305 : vector<2x32xf32>
    %307 = arith.mulf %270, %306 : vector<2x32xf32>
    %cst_52 = arith.constant 1.000000e+00 : f32
    %308 = vector.broadcast %cst_52 : f32 to vector<2x32xf32>
    %309 = arith.subf %308, %270 : vector<2x32xf32>
    %310 = arith.mulf %309, %229 : vector<2x32xf32>
    %311 = arith.addf %307, %310 : vector<2x32xf32>
    %312 = arith.mulf %270, %306 : vector<2x32xf32>
    %313 = arith.addf %231, %312 : vector<2x32xf32>
    %314 = vector.extract_strided_slice %276 {offsets = [0, 0], sizes = [2, 32], strides = [1, 1]} : vector<2x96xf32> to vector<2x32xf32>
    %315 = vector.extract_strided_slice %278 {offsets = [0, 0], sizes = [2, 32], strides = [1, 1]} : vector<2x96xf32> to vector<2x32xf32>
    %316 = arith.addf %314, %315 : vector<2x32xf32>
    %317 = arith.negf %316 : vector<2x32xf32>
    %318 = math.exp %317 : vector<2x32xf32>
    %cst_53 = arith.constant 1.000000e+00 : f32
    %319 = vector.broadcast %cst_53 : f32 to vector<2x32xf32>
    %320 = arith.addf %319, %318 : vector<2x32xf32>
    %321 = arith.divf %319, %320 : vector<2x32xf32>
    %322 = vector.extract_strided_slice %276 {offsets = [0, 32], sizes = [2, 32], strides = [1, 1]} : vector<2x96xf32> to vector<2x32xf32>
    %323 = vector.extract_strided_slice %278 {offsets = [0, 32], sizes = [2, 32], strides = [1, 1]} : vector<2x96xf32> to vector<2x32xf32>
    %324 = arith.addf %322, %323 : vector<2x32xf32>
    %325 = arith.negf %324 : vector<2x32xf32>
    %326 = math.exp %325 : vector<2x32xf32>
    %cst_54 = arith.constant 1.000000e+00 : f32
    %327 = vector.broadcast %cst_54 : f32 to vector<2x32xf32>
    %328 = arith.addf %327, %326 : vector<2x32xf32>
    %329 = arith.divf %327, %328 : vector<2x32xf32>
    %330 = vector.extract_strided_slice %276 {offsets = [0, 64], sizes = [2, 32], strides = [1, 1]} : vector<2x96xf32> to vector<2x32xf32>
    %331 = vector.extract_strided_slice %278 {offsets = [0, 64], sizes = [2, 32], strides = [1, 1]} : vector<2x96xf32> to vector<2x32xf32>
    %332 = vector.broadcast %9 : vector<1x32xf32> to vector<2x32xf32>
    %333 = arith.addf %331, %332 : vector<2x32xf32>
    %334 = arith.mulf %321, %333 : vector<2x32xf32>
    %335 = arith.addf %330, %334 : vector<2x32xf32>
    %336 = math.tanh %335 : vector<2x32xf32>
    %cst_55 = arith.constant 1.000000e+00 : f32
    %337 = vector.broadcast %cst_55 : f32 to vector<2x32xf32>
    %338 = arith.subf %337, %329 : vector<2x32xf32>
    %339 = arith.mulf %338, %336 : vector<2x32xf32>
    %340 = arith.mulf %329, %264 : vector<2x32xf32>
    %341 = arith.addf %339, %340 : vector<2x32xf32>
    %342 = arith.mulf %274, %341 : vector<2x32xf32>
    %cst_56 = arith.constant 1.000000e+00 : f32
    %343 = vector.broadcast %cst_56 : f32 to vector<2x32xf32>
    %344 = arith.subf %343, %274 : vector<2x32xf32>
    %345 = arith.mulf %344, %264 : vector<2x32xf32>
    %346 = arith.addf %342, %345 : vector<2x32xf32>
    %347 = arith.mulf %274, %341 : vector<2x32xf32>
    %348 = arith.addf %266, %347 : vector<2x32xf32>
    %cst_57 = arith.constant 4.000000e+00 : f32
    %349 = vector.broadcast %cst_57 : f32 to vector<2x32xf32>
    %350 = arith.cmpf ogt, %19, %349 : vector<2x32xf32>
    %351 = arith.extui %350 : vector<2x32xi1> to vector<2x32xi32>
    %352 = arith.sitofp %351 : vector<2x32xi32> to vector<2x32xf32>
    %cst_58 = arith.constant 3.000000e+00 : f32
    %353 = vector.broadcast %cst_58 : f32 to vector<2x32xf32>
    %354 = arith.cmpf ogt, %19, %353 : vector<2x32xf32>
    %355 = arith.extui %354 : vector<2x32xi1> to vector<2x32xi32>
    %356 = arith.sitofp %355 : vector<2x32xi32> to vector<2x32xf32>
    %357 = vector.extract_strided_slice %13 {offsets = [8, 0], sizes = [2, 96], strides = [1, 1]} : vector<16x96xf32> to vector<2x96xf32>
    %358 = vector.extract_strided_slice %16 {offsets = [6, 0], sizes = [2, 96], strides = [1, 1]} : vector<16x96xf32> to vector<2x96xf32>
    %cst_59 = arith.constant dense<0.000000e+00> : vector<2x96xf32>
    %359 = tpu.matmul %311, %3, %cst_59 {dimension_numbers = #tpu.dot_dimension_numbers<[1], [0], [0], [1], [0, 0, 1, 1], [], []>} : vector<2x32xf32>, vector<32x96xf32>, vector<2x96xf32> -> vector<2x96xf32>
    %cst_60 = arith.constant dense<0.000000e+00> : vector<2x96xf32>
    %360 = tpu.matmul %346, %4, %cst_60 {dimension_numbers = #tpu.dot_dimension_numbers<[1], [0], [0], [1], [0, 0, 1, 1], [], []>} : vector<2x32xf32>, vector<32x96xf32>, vector<2x96xf32> -> vector<2x96xf32>
    %361 = vector.extract_strided_slice %357 {offsets = [0, 0], sizes = [2, 32], strides = [1, 1]} : vector<2x96xf32> to vector<2x32xf32>
    %362 = vector.extract_strided_slice %359 {offsets = [0, 0], sizes = [2, 32], strides = [1, 1]} : vector<2x96xf32> to vector<2x32xf32>
    %363 = arith.addf %361, %362 : vector<2x32xf32>
    %364 = arith.negf %363 : vector<2x32xf32>
    %365 = math.exp %364 : vector<2x32xf32>
    %cst_61 = arith.constant 1.000000e+00 : f32
    %366 = vector.broadcast %cst_61 : f32 to vector<2x32xf32>
    %367 = arith.addf %366, %365 : vector<2x32xf32>
    %368 = arith.divf %366, %367 : vector<2x32xf32>
    %369 = vector.extract_strided_slice %357 {offsets = [0, 32], sizes = [2, 32], strides = [1, 1]} : vector<2x96xf32> to vector<2x32xf32>
    %370 = vector.extract_strided_slice %359 {offsets = [0, 32], sizes = [2, 32], strides = [1, 1]} : vector<2x96xf32> to vector<2x32xf32>
    %371 = arith.addf %369, %370 : vector<2x32xf32>
    %372 = arith.negf %371 : vector<2x32xf32>
    %373 = math.exp %372 : vector<2x32xf32>
    %cst_62 = arith.constant 1.000000e+00 : f32
    %374 = vector.broadcast %cst_62 : f32 to vector<2x32xf32>
    %375 = arith.addf %374, %373 : vector<2x32xf32>
    %376 = arith.divf %374, %375 : vector<2x32xf32>
    %377 = vector.extract_strided_slice %357 {offsets = [0, 64], sizes = [2, 32], strides = [1, 1]} : vector<2x96xf32> to vector<2x32xf32>
    %378 = vector.extract_strided_slice %359 {offsets = [0, 64], sizes = [2, 32], strides = [1, 1]} : vector<2x96xf32> to vector<2x32xf32>
    %379 = vector.broadcast %8 : vector<1x32xf32> to vector<2x32xf32>
    %380 = arith.addf %378, %379 : vector<2x32xf32>
    %381 = arith.mulf %368, %380 : vector<2x32xf32>
    %382 = arith.addf %377, %381 : vector<2x32xf32>
    %383 = math.tanh %382 : vector<2x32xf32>
    %cst_63 = arith.constant 1.000000e+00 : f32
    %384 = vector.broadcast %cst_63 : f32 to vector<2x32xf32>
    %385 = arith.subf %384, %376 : vector<2x32xf32>
    %386 = arith.mulf %385, %383 : vector<2x32xf32>
    %387 = arith.mulf %376, %311 : vector<2x32xf32>
    %388 = arith.addf %386, %387 : vector<2x32xf32>
    %389 = arith.mulf %352, %388 : vector<2x32xf32>
    %cst_64 = arith.constant 1.000000e+00 : f32
    %390 = vector.broadcast %cst_64 : f32 to vector<2x32xf32>
    %391 = arith.subf %390, %352 : vector<2x32xf32>
    %392 = arith.mulf %391, %311 : vector<2x32xf32>
    %393 = arith.addf %389, %392 : vector<2x32xf32>
    %394 = arith.mulf %352, %388 : vector<2x32xf32>
    %395 = arith.addf %313, %394 : vector<2x32xf32>
    %396 = vector.extract_strided_slice %358 {offsets = [0, 0], sizes = [2, 32], strides = [1, 1]} : vector<2x96xf32> to vector<2x32xf32>
    %397 = vector.extract_strided_slice %360 {offsets = [0, 0], sizes = [2, 32], strides = [1, 1]} : vector<2x96xf32> to vector<2x32xf32>
    %398 = arith.addf %396, %397 : vector<2x32xf32>
    %399 = arith.negf %398 : vector<2x32xf32>
    %400 = math.exp %399 : vector<2x32xf32>
    %cst_65 = arith.constant 1.000000e+00 : f32
    %401 = vector.broadcast %cst_65 : f32 to vector<2x32xf32>
    %402 = arith.addf %401, %400 : vector<2x32xf32>
    %403 = arith.divf %401, %402 : vector<2x32xf32>
    %404 = vector.extract_strided_slice %358 {offsets = [0, 32], sizes = [2, 32], strides = [1, 1]} : vector<2x96xf32> to vector<2x32xf32>
    %405 = vector.extract_strided_slice %360 {offsets = [0, 32], sizes = [2, 32], strides = [1, 1]} : vector<2x96xf32> to vector<2x32xf32>
    %406 = arith.addf %404, %405 : vector<2x32xf32>
    %407 = arith.negf %406 : vector<2x32xf32>
    %408 = math.exp %407 : vector<2x32xf32>
    %cst_66 = arith.constant 1.000000e+00 : f32
    %409 = vector.broadcast %cst_66 : f32 to vector<2x32xf32>
    %410 = arith.addf %409, %408 : vector<2x32xf32>
    %411 = arith.divf %409, %410 : vector<2x32xf32>
    %412 = vector.extract_strided_slice %358 {offsets = [0, 64], sizes = [2, 32], strides = [1, 1]} : vector<2x96xf32> to vector<2x32xf32>
    %413 = vector.extract_strided_slice %360 {offsets = [0, 64], sizes = [2, 32], strides = [1, 1]} : vector<2x96xf32> to vector<2x32xf32>
    %414 = vector.broadcast %9 : vector<1x32xf32> to vector<2x32xf32>
    %415 = arith.addf %413, %414 : vector<2x32xf32>
    %416 = arith.mulf %403, %415 : vector<2x32xf32>
    %417 = arith.addf %412, %416 : vector<2x32xf32>
    %418 = math.tanh %417 : vector<2x32xf32>
    %cst_67 = arith.constant 1.000000e+00 : f32
    %419 = vector.broadcast %cst_67 : f32 to vector<2x32xf32>
    %420 = arith.subf %419, %411 : vector<2x32xf32>
    %421 = arith.mulf %420, %418 : vector<2x32xf32>
    %422 = arith.mulf %411, %346 : vector<2x32xf32>
    %423 = arith.addf %421, %422 : vector<2x32xf32>
    %424 = arith.mulf %356, %423 : vector<2x32xf32>
    %cst_68 = arith.constant 1.000000e+00 : f32
    %425 = vector.broadcast %cst_68 : f32 to vector<2x32xf32>
    %426 = arith.subf %425, %356 : vector<2x32xf32>
    %427 = arith.mulf %426, %346 : vector<2x32xf32>
    %428 = arith.addf %424, %427 : vector<2x32xf32>
    %429 = arith.mulf %356, %423 : vector<2x32xf32>
    %430 = arith.addf %348, %429 : vector<2x32xf32>
    %cst_69 = arith.constant 5.000000e+00 : f32
    %431 = vector.broadcast %cst_69 : f32 to vector<2x32xf32>
    %432 = arith.cmpf ogt, %19, %431 : vector<2x32xf32>
    %433 = arith.extui %432 : vector<2x32xi1> to vector<2x32xi32>
    %434 = arith.sitofp %433 : vector<2x32xi32> to vector<2x32xf32>
    %cst_70 = arith.constant 2.000000e+00 : f32
    %435 = vector.broadcast %cst_70 : f32 to vector<2x32xf32>
    %436 = arith.cmpf ogt, %19, %435 : vector<2x32xf32>
    %437 = arith.extui %436 : vector<2x32xi1> to vector<2x32xi32>
    %438 = arith.sitofp %437 : vector<2x32xi32> to vector<2x32xf32>
    %439 = vector.extract_strided_slice %13 {offsets = [10, 0], sizes = [2, 96], strides = [1, 1]} : vector<16x96xf32> to vector<2x96xf32>
    %440 = vector.extract_strided_slice %16 {offsets = [4, 0], sizes = [2, 96], strides = [1, 1]} : vector<16x96xf32> to vector<2x96xf32>
    %cst_71 = arith.constant dense<0.000000e+00> : vector<2x96xf32>
    %441 = tpu.matmul %393, %3, %cst_71 {dimension_numbers = #tpu.dot_dimension_numbers<[1], [0], [0], [1], [0, 0, 1, 1], [], []>} : vector<2x32xf32>, vector<32x96xf32>, vector<2x96xf32> -> vector<2x96xf32>
    %cst_72 = arith.constant dense<0.000000e+00> : vector<2x96xf32>
    %442 = tpu.matmul %428, %4, %cst_72 {dimension_numbers = #tpu.dot_dimension_numbers<[1], [0], [0], [1], [0, 0, 1, 1], [], []>} : vector<2x32xf32>, vector<32x96xf32>, vector<2x96xf32> -> vector<2x96xf32>
    %443 = vector.extract_strided_slice %439 {offsets = [0, 0], sizes = [2, 32], strides = [1, 1]} : vector<2x96xf32> to vector<2x32xf32>
    %444 = vector.extract_strided_slice %441 {offsets = [0, 0], sizes = [2, 32], strides = [1, 1]} : vector<2x96xf32> to vector<2x32xf32>
    %445 = arith.addf %443, %444 : vector<2x32xf32>
    %446 = arith.negf %445 : vector<2x32xf32>
    %447 = math.exp %446 : vector<2x32xf32>
    %cst_73 = arith.constant 1.000000e+00 : f32
    %448 = vector.broadcast %cst_73 : f32 to vector<2x32xf32>
    %449 = arith.addf %448, %447 : vector<2x32xf32>
    %450 = arith.divf %448, %449 : vector<2x32xf32>
    %451 = vector.extract_strided_slice %439 {offsets = [0, 32], sizes = [2, 32], strides = [1, 1]} : vector<2x96xf32> to vector<2x32xf32>
    %452 = vector.extract_strided_slice %441 {offsets = [0, 32], sizes = [2, 32], strides = [1, 1]} : vector<2x96xf32> to vector<2x32xf32>
    %453 = arith.addf %451, %452 : vector<2x32xf32>
    %454 = arith.negf %453 : vector<2x32xf32>
    %455 = math.exp %454 : vector<2x32xf32>
    %cst_74 = arith.constant 1.000000e+00 : f32
    %456 = vector.broadcast %cst_74 : f32 to vector<2x32xf32>
    %457 = arith.addf %456, %455 : vector<2x32xf32>
    %458 = arith.divf %456, %457 : vector<2x32xf32>
    %459 = vector.extract_strided_slice %439 {offsets = [0, 64], sizes = [2, 32], strides = [1, 1]} : vector<2x96xf32> to vector<2x32xf32>
    %460 = vector.extract_strided_slice %441 {offsets = [0, 64], sizes = [2, 32], strides = [1, 1]} : vector<2x96xf32> to vector<2x32xf32>
    %461 = vector.broadcast %8 : vector<1x32xf32> to vector<2x32xf32>
    %462 = arith.addf %460, %461 : vector<2x32xf32>
    %463 = arith.mulf %450, %462 : vector<2x32xf32>
    %464 = arith.addf %459, %463 : vector<2x32xf32>
    %465 = math.tanh %464 : vector<2x32xf32>
    %cst_75 = arith.constant 1.000000e+00 : f32
    %466 = vector.broadcast %cst_75 : f32 to vector<2x32xf32>
    %467 = arith.subf %466, %458 : vector<2x32xf32>
    %468 = arith.mulf %467, %465 : vector<2x32xf32>
    %469 = arith.mulf %458, %393 : vector<2x32xf32>
    %470 = arith.addf %468, %469 : vector<2x32xf32>
    %471 = arith.mulf %434, %470 : vector<2x32xf32>
    %cst_76 = arith.constant 1.000000e+00 : f32
    %472 = vector.broadcast %cst_76 : f32 to vector<2x32xf32>
    %473 = arith.subf %472, %434 : vector<2x32xf32>
    %474 = arith.mulf %473, %393 : vector<2x32xf32>
    %475 = arith.addf %471, %474 : vector<2x32xf32>
    %476 = arith.mulf %434, %470 : vector<2x32xf32>
    %477 = arith.addf %395, %476 : vector<2x32xf32>
    %478 = vector.extract_strided_slice %440 {offsets = [0, 0], sizes = [2, 32], strides = [1, 1]} : vector<2x96xf32> to vector<2x32xf32>
    %479 = vector.extract_strided_slice %442 {offsets = [0, 0], sizes = [2, 32], strides = [1, 1]} : vector<2x96xf32> to vector<2x32xf32>
    %480 = arith.addf %478, %479 : vector<2x32xf32>
    %481 = arith.negf %480 : vector<2x32xf32>
    %482 = math.exp %481 : vector<2x32xf32>
    %cst_77 = arith.constant 1.000000e+00 : f32
    %483 = vector.broadcast %cst_77 : f32 to vector<2x32xf32>
    %484 = arith.addf %483, %482 : vector<2x32xf32>
    %485 = arith.divf %483, %484 : vector<2x32xf32>
    %486 = vector.extract_strided_slice %440 {offsets = [0, 32], sizes = [2, 32], strides = [1, 1]} : vector<2x96xf32> to vector<2x32xf32>
    %487 = vector.extract_strided_slice %442 {offsets = [0, 32], sizes = [2, 32], strides = [1, 1]} : vector<2x96xf32> to vector<2x32xf32>
    %488 = arith.addf %486, %487 : vector<2x32xf32>
    %489 = arith.negf %488 : vector<2x32xf32>
    %490 = math.exp %489 : vector<2x32xf32>
    %cst_78 = arith.constant 1.000000e+00 : f32
    %491 = vector.broadcast %cst_78 : f32 to vector<2x32xf32>
    %492 = arith.addf %491, %490 : vector<2x32xf32>
    %493 = arith.divf %491, %492 : vector<2x32xf32>
    %494 = vector.extract_strided_slice %440 {offsets = [0, 64], sizes = [2, 32], strides = [1, 1]} : vector<2x96xf32> to vector<2x32xf32>
    %495 = vector.extract_strided_slice %442 {offsets = [0, 64], sizes = [2, 32], strides = [1, 1]} : vector<2x96xf32> to vector<2x32xf32>
    %496 = vector.broadcast %9 : vector<1x32xf32> to vector<2x32xf32>
    %497 = arith.addf %495, %496 : vector<2x32xf32>
    %498 = arith.mulf %485, %497 : vector<2x32xf32>
    %499 = arith.addf %494, %498 : vector<2x32xf32>
    %500 = math.tanh %499 : vector<2x32xf32>
    %cst_79 = arith.constant 1.000000e+00 : f32
    %501 = vector.broadcast %cst_79 : f32 to vector<2x32xf32>
    %502 = arith.subf %501, %493 : vector<2x32xf32>
    %503 = arith.mulf %502, %500 : vector<2x32xf32>
    %504 = arith.mulf %493, %428 : vector<2x32xf32>
    %505 = arith.addf %503, %504 : vector<2x32xf32>
    %506 = arith.mulf %438, %505 : vector<2x32xf32>
    %cst_80 = arith.constant 1.000000e+00 : f32
    %507 = vector.broadcast %cst_80 : f32 to vector<2x32xf32>
    %508 = arith.subf %507, %438 : vector<2x32xf32>
    %509 = arith.mulf %508, %428 : vector<2x32xf32>
    %510 = arith.addf %506, %509 : vector<2x32xf32>
    %511 = arith.mulf %438, %505 : vector<2x32xf32>
    %512 = arith.addf %430, %511 : vector<2x32xf32>
    %cst_81 = arith.constant 6.000000e+00 : f32
    %513 = vector.broadcast %cst_81 : f32 to vector<2x32xf32>
    %514 = arith.cmpf ogt, %19, %513 : vector<2x32xf32>
    %515 = arith.extui %514 : vector<2x32xi1> to vector<2x32xi32>
    %516 = arith.sitofp %515 : vector<2x32xi32> to vector<2x32xf32>
    %cst_82 = arith.constant 1.000000e+00 : f32
    %517 = vector.broadcast %cst_82 : f32 to vector<2x32xf32>
    %518 = arith.cmpf ogt, %19, %517 : vector<2x32xf32>
    %519 = arith.extui %518 : vector<2x32xi1> to vector<2x32xi32>
    %520 = arith.sitofp %519 : vector<2x32xi32> to vector<2x32xf32>
    %521 = vector.extract_strided_slice %13 {offsets = [12, 0], sizes = [2, 96], strides = [1, 1]} : vector<16x96xf32> to vector<2x96xf32>
    %522 = vector.extract_strided_slice %16 {offsets = [2, 0], sizes = [2, 96], strides = [1, 1]} : vector<16x96xf32> to vector<2x96xf32>
    %cst_83 = arith.constant dense<0.000000e+00> : vector<2x96xf32>
    %523 = tpu.matmul %475, %3, %cst_83 {dimension_numbers = #tpu.dot_dimension_numbers<[1], [0], [0], [1], [0, 0, 1, 1], [], []>} : vector<2x32xf32>, vector<32x96xf32>, vector<2x96xf32> -> vector<2x96xf32>
    %cst_84 = arith.constant dense<0.000000e+00> : vector<2x96xf32>
    %524 = tpu.matmul %510, %4, %cst_84 {dimension_numbers = #tpu.dot_dimension_numbers<[1], [0], [0], [1], [0, 0, 1, 1], [], []>} : vector<2x32xf32>, vector<32x96xf32>, vector<2x96xf32> -> vector<2x96xf32>
    %525 = vector.extract_strided_slice %521 {offsets = [0, 0], sizes = [2, 32], strides = [1, 1]} : vector<2x96xf32> to vector<2x32xf32>
    %526 = vector.extract_strided_slice %523 {offsets = [0, 0], sizes = [2, 32], strides = [1, 1]} : vector<2x96xf32> to vector<2x32xf32>
    %527 = arith.addf %525, %526 : vector<2x32xf32>
    %528 = arith.negf %527 : vector<2x32xf32>
    %529 = math.exp %528 : vector<2x32xf32>
    %cst_85 = arith.constant 1.000000e+00 : f32
    %530 = vector.broadcast %cst_85 : f32 to vector<2x32xf32>
    %531 = arith.addf %530, %529 : vector<2x32xf32>
    %532 = arith.divf %530, %531 : vector<2x32xf32>
    %533 = vector.extract_strided_slice %521 {offsets = [0, 32], sizes = [2, 32], strides = [1, 1]} : vector<2x96xf32> to vector<2x32xf32>
    %534 = vector.extract_strided_slice %523 {offsets = [0, 32], sizes = [2, 32], strides = [1, 1]} : vector<2x96xf32> to vector<2x32xf32>
    %535 = arith.addf %533, %534 : vector<2x32xf32>
    %536 = arith.negf %535 : vector<2x32xf32>
    %537 = math.exp %536 : vector<2x32xf32>
    %cst_86 = arith.constant 1.000000e+00 : f32
    %538 = vector.broadcast %cst_86 : f32 to vector<2x32xf32>
    %539 = arith.addf %538, %537 : vector<2x32xf32>
    %540 = arith.divf %538, %539 : vector<2x32xf32>
    %541 = vector.extract_strided_slice %521 {offsets = [0, 64], sizes = [2, 32], strides = [1, 1]} : vector<2x96xf32> to vector<2x32xf32>
    %542 = vector.extract_strided_slice %523 {offsets = [0, 64], sizes = [2, 32], strides = [1, 1]} : vector<2x96xf32> to vector<2x32xf32>
    %543 = vector.broadcast %8 : vector<1x32xf32> to vector<2x32xf32>
    %544 = arith.addf %542, %543 : vector<2x32xf32>
    %545 = arith.mulf %532, %544 : vector<2x32xf32>
    %546 = arith.addf %541, %545 : vector<2x32xf32>
    %547 = math.tanh %546 : vector<2x32xf32>
    %cst_87 = arith.constant 1.000000e+00 : f32
    %548 = vector.broadcast %cst_87 : f32 to vector<2x32xf32>
    %549 = arith.subf %548, %540 : vector<2x32xf32>
    %550 = arith.mulf %549, %547 : vector<2x32xf32>
    %551 = arith.mulf %540, %475 : vector<2x32xf32>
    %552 = arith.addf %550, %551 : vector<2x32xf32>
    %553 = arith.mulf %516, %552 : vector<2x32xf32>
    %cst_88 = arith.constant 1.000000e+00 : f32
    %554 = vector.broadcast %cst_88 : f32 to vector<2x32xf32>
    %555 = arith.subf %554, %516 : vector<2x32xf32>
    %556 = arith.mulf %555, %475 : vector<2x32xf32>
    %557 = arith.addf %553, %556 : vector<2x32xf32>
    %558 = arith.mulf %516, %552 : vector<2x32xf32>
    %559 = arith.addf %477, %558 : vector<2x32xf32>
    %560 = vector.extract_strided_slice %522 {offsets = [0, 0], sizes = [2, 32], strides = [1, 1]} : vector<2x96xf32> to vector<2x32xf32>
    %561 = vector.extract_strided_slice %524 {offsets = [0, 0], sizes = [2, 32], strides = [1, 1]} : vector<2x96xf32> to vector<2x32xf32>
    %562 = arith.addf %560, %561 : vector<2x32xf32>
    %563 = arith.negf %562 : vector<2x32xf32>
    %564 = math.exp %563 : vector<2x32xf32>
    %cst_89 = arith.constant 1.000000e+00 : f32
    %565 = vector.broadcast %cst_89 : f32 to vector<2x32xf32>
    %566 = arith.addf %565, %564 : vector<2x32xf32>
    %567 = arith.divf %565, %566 : vector<2x32xf32>
    %568 = vector.extract_strided_slice %522 {offsets = [0, 32], sizes = [2, 32], strides = [1, 1]} : vector<2x96xf32> to vector<2x32xf32>
    %569 = vector.extract_strided_slice %524 {offsets = [0, 32], sizes = [2, 32], strides = [1, 1]} : vector<2x96xf32> to vector<2x32xf32>
    %570 = arith.addf %568, %569 : vector<2x32xf32>
    %571 = arith.negf %570 : vector<2x32xf32>
    %572 = math.exp %571 : vector<2x32xf32>
    %cst_90 = arith.constant 1.000000e+00 : f32
    %573 = vector.broadcast %cst_90 : f32 to vector<2x32xf32>
    %574 = arith.addf %573, %572 : vector<2x32xf32>
    %575 = arith.divf %573, %574 : vector<2x32xf32>
    %576 = vector.extract_strided_slice %522 {offsets = [0, 64], sizes = [2, 32], strides = [1, 1]} : vector<2x96xf32> to vector<2x32xf32>
    %577 = vector.extract_strided_slice %524 {offsets = [0, 64], sizes = [2, 32], strides = [1, 1]} : vector<2x96xf32> to vector<2x32xf32>
    %578 = vector.broadcast %9 : vector<1x32xf32> to vector<2x32xf32>
    %579 = arith.addf %577, %578 : vector<2x32xf32>
    %580 = arith.mulf %567, %579 : vector<2x32xf32>
    %581 = arith.addf %576, %580 : vector<2x32xf32>
    %582 = math.tanh %581 : vector<2x32xf32>
    %cst_91 = arith.constant 1.000000e+00 : f32
    %583 = vector.broadcast %cst_91 : f32 to vector<2x32xf32>
    %584 = arith.subf %583, %575 : vector<2x32xf32>
    %585 = arith.mulf %584, %582 : vector<2x32xf32>
    %586 = arith.mulf %575, %510 : vector<2x32xf32>
    %587 = arith.addf %585, %586 : vector<2x32xf32>
    %588 = arith.mulf %520, %587 : vector<2x32xf32>
    %cst_92 = arith.constant 1.000000e+00 : f32
    %589 = vector.broadcast %cst_92 : f32 to vector<2x32xf32>
    %590 = arith.subf %589, %520 : vector<2x32xf32>
    %591 = arith.mulf %590, %510 : vector<2x32xf32>
    %592 = arith.addf %588, %591 : vector<2x32xf32>
    %593 = arith.mulf %520, %587 : vector<2x32xf32>
    %594 = arith.addf %512, %593 : vector<2x32xf32>
    %cst_93 = arith.constant 7.000000e+00 : f32
    %595 = vector.broadcast %cst_93 : f32 to vector<2x32xf32>
    %596 = arith.cmpf ogt, %19, %595 : vector<2x32xf32>
    %597 = arith.extui %596 : vector<2x32xi1> to vector<2x32xi32>
    %598 = arith.sitofp %597 : vector<2x32xi32> to vector<2x32xf32>
    %cst_94 = arith.constant 0.000000e+00 : f32
    %599 = vector.broadcast %cst_94 : f32 to vector<2x32xf32>
    %600 = arith.cmpf ogt, %19, %599 : vector<2x32xf32>
    %601 = arith.extui %600 : vector<2x32xi1> to vector<2x32xi32>
    %602 = arith.sitofp %601 : vector<2x32xi32> to vector<2x32xf32>
    %603 = vector.extract_strided_slice %13 {offsets = [14, 0], sizes = [2, 96], strides = [1, 1]} : vector<16x96xf32> to vector<2x96xf32>
    %604 = vector.extract_strided_slice %16 {offsets = [0, 0], sizes = [2, 96], strides = [1, 1]} : vector<16x96xf32> to vector<2x96xf32>
    %cst_95 = arith.constant dense<0.000000e+00> : vector<2x96xf32>
    %605 = tpu.matmul %557, %3, %cst_95 {dimension_numbers = #tpu.dot_dimension_numbers<[1], [0], [0], [1], [0, 0, 1, 1], [], []>} : vector<2x32xf32>, vector<32x96xf32>, vector<2x96xf32> -> vector<2x96xf32>
    %cst_96 = arith.constant dense<0.000000e+00> : vector<2x96xf32>
    %606 = tpu.matmul %592, %4, %cst_96 {dimension_numbers = #tpu.dot_dimension_numbers<[1], [0], [0], [1], [0, 0, 1, 1], [], []>} : vector<2x32xf32>, vector<32x96xf32>, vector<2x96xf32> -> vector<2x96xf32>
    %607 = vector.extract_strided_slice %603 {offsets = [0, 0], sizes = [2, 32], strides = [1, 1]} : vector<2x96xf32> to vector<2x32xf32>
    %608 = vector.extract_strided_slice %605 {offsets = [0, 0], sizes = [2, 32], strides = [1, 1]} : vector<2x96xf32> to vector<2x32xf32>
    %609 = arith.addf %607, %608 : vector<2x32xf32>
    %610 = arith.negf %609 : vector<2x32xf32>
    %611 = math.exp %610 : vector<2x32xf32>
    %cst_97 = arith.constant 1.000000e+00 : f32
    %612 = vector.broadcast %cst_97 : f32 to vector<2x32xf32>
    %613 = arith.addf %612, %611 : vector<2x32xf32>
    %614 = arith.divf %612, %613 : vector<2x32xf32>
    %615 = vector.extract_strided_slice %603 {offsets = [0, 32], sizes = [2, 32], strides = [1, 1]} : vector<2x96xf32> to vector<2x32xf32>
    %616 = vector.extract_strided_slice %605 {offsets = [0, 32], sizes = [2, 32], strides = [1, 1]} : vector<2x96xf32> to vector<2x32xf32>
    %617 = arith.addf %615, %616 : vector<2x32xf32>
    %618 = arith.negf %617 : vector<2x32xf32>
    %619 = math.exp %618 : vector<2x32xf32>
    %cst_98 = arith.constant 1.000000e+00 : f32
    %620 = vector.broadcast %cst_98 : f32 to vector<2x32xf32>
    %621 = arith.addf %620, %619 : vector<2x32xf32>
    %622 = arith.divf %620, %621 : vector<2x32xf32>
    %623 = vector.extract_strided_slice %603 {offsets = [0, 64], sizes = [2, 32], strides = [1, 1]} : vector<2x96xf32> to vector<2x32xf32>
    %624 = vector.extract_strided_slice %605 {offsets = [0, 64], sizes = [2, 32], strides = [1, 1]} : vector<2x96xf32> to vector<2x32xf32>
    %625 = vector.broadcast %8 : vector<1x32xf32> to vector<2x32xf32>
    %626 = arith.addf %624, %625 : vector<2x32xf32>
    %627 = arith.mulf %614, %626 : vector<2x32xf32>
    %628 = arith.addf %623, %627 : vector<2x32xf32>
    %629 = math.tanh %628 : vector<2x32xf32>
    %cst_99 = arith.constant 1.000000e+00 : f32
    %630 = vector.broadcast %cst_99 : f32 to vector<2x32xf32>
    %631 = arith.subf %630, %622 : vector<2x32xf32>
    %632 = arith.mulf %631, %629 : vector<2x32xf32>
    %633 = arith.mulf %622, %557 : vector<2x32xf32>
    %634 = arith.addf %632, %633 : vector<2x32xf32>
    %635 = arith.mulf %598, %634 : vector<2x32xf32>
    %636 = arith.addf %559, %635 : vector<2x32xf32>
    %637 = vector.extract_strided_slice %604 {offsets = [0, 0], sizes = [2, 32], strides = [1, 1]} : vector<2x96xf32> to vector<2x32xf32>
    %638 = vector.extract_strided_slice %606 {offsets = [0, 0], sizes = [2, 32], strides = [1, 1]} : vector<2x96xf32> to vector<2x32xf32>
    %639 = arith.addf %637, %638 : vector<2x32xf32>
    %640 = arith.negf %639 : vector<2x32xf32>
    %641 = math.exp %640 : vector<2x32xf32>
    %cst_100 = arith.constant 1.000000e+00 : f32
    %642 = vector.broadcast %cst_100 : f32 to vector<2x32xf32>
    %643 = arith.addf %642, %641 : vector<2x32xf32>
    %644 = arith.divf %642, %643 : vector<2x32xf32>
    %645 = vector.extract_strided_slice %604 {offsets = [0, 32], sizes = [2, 32], strides = [1, 1]} : vector<2x96xf32> to vector<2x32xf32>
    %646 = vector.extract_strided_slice %606 {offsets = [0, 32], sizes = [2, 32], strides = [1, 1]} : vector<2x96xf32> to vector<2x32xf32>
    %647 = arith.addf %645, %646 : vector<2x32xf32>
    %648 = arith.negf %647 : vector<2x32xf32>
    %649 = math.exp %648 : vector<2x32xf32>
    %cst_101 = arith.constant 1.000000e+00 : f32
    %650 = vector.broadcast %cst_101 : f32 to vector<2x32xf32>
    %651 = arith.addf %650, %649 : vector<2x32xf32>
    %652 = arith.divf %650, %651 : vector<2x32xf32>
    %653 = vector.extract_strided_slice %604 {offsets = [0, 64], sizes = [2, 32], strides = [1, 1]} : vector<2x96xf32> to vector<2x32xf32>
    %654 = vector.extract_strided_slice %606 {offsets = [0, 64], sizes = [2, 32], strides = [1, 1]} : vector<2x96xf32> to vector<2x32xf32>
    %655 = vector.broadcast %9 : vector<1x32xf32> to vector<2x32xf32>
    %656 = arith.addf %654, %655 : vector<2x32xf32>
    %657 = arith.mulf %644, %656 : vector<2x32xf32>
    %658 = arith.addf %653, %657 : vector<2x32xf32>
    %659 = math.tanh %658 : vector<2x32xf32>
    %cst_102 = arith.constant 1.000000e+00 : f32
    %660 = vector.broadcast %cst_102 : f32 to vector<2x32xf32>
    %661 = arith.subf %660, %652 : vector<2x32xf32>
    %662 = arith.mulf %661, %659 : vector<2x32xf32>
    %663 = arith.mulf %652, %592 : vector<2x32xf32>
    %664 = arith.addf %662, %663 : vector<2x32xf32>
    %665 = arith.mulf %602, %664 : vector<2x32xf32>
    %666 = arith.addf %594, %665 : vector<2x32xf32>
    %667 = tpu.reciprocal %19 {approx = true} : vector<2x32xf32> -> vector<2x32xf32>
    %668 = arith.mulf %636, %667 : vector<2x32xf32>
    %669 = arith.mulf %666, %667 : vector<2x32xf32>
    %c0_103 = arith.constant 0 : index
    %c0_104 = arith.constant 0 : index
    %670 = vector.load %arg5[%c0_103, %c0_104] : memref<96x32xf32, #tpu.memory_space<vmem>>, vector<96x32xf32>
    %c0_105 = arith.constant 0 : index
    %c0_106 = arith.constant 0 : index
    %671 = vector.load %arg7[%c0_105, %c0_106] : memref<5x128xf32, #tpu.memory_space<vmem>>, vector<5x128xf32>
    %672 = vector.extract_strided_slice %671 {offsets = [0, 0], sizes = [1, 32], strides = [1, 1]} : vector<5x128xf32> to vector<1x32xf32>
    %673 = vector.extract_strided_slice %671 {offsets = [1, 0], sizes = [1, 32], strides = [1, 1]} : vector<5x128xf32> to vector<1x32xf32>
    %674 = vector.extract_strided_slice %671 {offsets = [2, 0], sizes = [1, 32], strides = [1, 1]} : vector<5x128xf32> to vector<1x32xf32>
    %675 = vector.extract_strided_slice %670 {offsets = [0, 0], sizes = [32, 32], strides = [1, 1]} : vector<96x32xf32> to vector<32x32xf32>
    %cst_107 = arith.constant dense<0.000000e+00> : vector<2x32xf32>
    %676 = tpu.matmul %668, %675, %cst_107 {dimension_numbers = #tpu.dot_dimension_numbers<[1], [0], [0], [1], [0, 0, 1, 1], [], []>} : vector<2x32xf32>, vector<32x32xf32>, vector<2x32xf32> -> vector<2x32xf32>
    %677 = vector.extract_strided_slice %670 {offsets = [32, 0], sizes = [32, 32], strides = [1, 1]} : vector<96x32xf32> to vector<32x32xf32>
    %cst_108 = arith.constant dense<0.000000e+00> : vector<2x32xf32>
    %678 = tpu.matmul %669, %677, %cst_108 {dimension_numbers = #tpu.dot_dimension_numbers<[1], [0], [0], [1], [0, 0, 1, 1], [], []>} : vector<2x32xf32>, vector<32x32xf32>, vector<2x32xf32> -> vector<2x32xf32>
    %679 = arith.addf %676, %678 : vector<2x32xf32>
    %c0_109 = arith.constant 0 : index
    %c0_110 = arith.constant 0 : index
    %680 = vector.load %arg1[%c0_109, %c0_110] : memref<2x32xf32, #tpu.memory_space<vmem>>, vector<2x32xf32>
    %681 = vector.extract_strided_slice %670 {offsets = [64, 0], sizes = [32, 32], strides = [1, 1]} : vector<96x32xf32> to vector<32x32xf32>
    %cst_111 = arith.constant dense<0.000000e+00> : vector<2x32xf32>
    %682 = tpu.matmul %680, %681, %cst_111 {dimension_numbers = #tpu.dot_dimension_numbers<[1], [0], [0], [1], [0, 0, 1, 1], [], []>} : vector<2x32xf32>, vector<32x32xf32>, vector<2x32xf32> -> vector<2x32xf32>
    %683 = arith.addf %679, %682 : vector<2x32xf32>
    %684 = vector.broadcast %672 : vector<1x32xf32> to vector<2x32xf32>
    %685 = arith.addf %683, %684 : vector<2x32xf32>
    %cst_112 = arith.constant dense<0.000000e+00> : vector<2xf32>
    %686 = vector.multi_reduction <add>, %685, %cst_112 [1] : vector<2x32xf32> to vector<2xf32>
    %687 = vector.shape_cast %686 : vector<2xf32> to vector<2x1xf32>
    %cst_113 = arith.constant 3.200000e+01 : f32
    %688 = vector.broadcast %cst_113 : f32 to vector<2x1xf32>
    %689 = arith.divf %687, %688 : vector<2x1xf32>
    %690 = vector.broadcast %689 : vector<2x1xf32> to vector<2x32xf32>
    %691 = arith.subf %685, %690 : vector<2x32xf32>
    %692 = arith.mulf %691, %691 : vector<2x32xf32>
    %cst_114 = arith.constant dense<0.000000e+00> : vector<2xf32>
    %693 = vector.multi_reduction <add>, %692, %cst_114 [1] : vector<2x32xf32> to vector<2xf32>
    %694 = vector.shape_cast %693 : vector<2xf32> to vector<2x1xf32>
    %cst_115 = arith.constant 3.200000e+01 : f32
    %695 = vector.broadcast %cst_115 : f32 to vector<2x1xf32>
    %696 = arith.divf %694, %695 : vector<2x1xf32>
    %697 = vector.broadcast %689 : vector<2x1xf32> to vector<2x32xf32>
    %698 = arith.subf %685, %697 : vector<2x32xf32>
    %cst_116 = arith.constant 9.99999974E-6 : f32
    %699 = vector.broadcast %cst_116 : f32 to vector<2x1xf32>
    %700 = arith.addf %696, %699 : vector<2x1xf32>
    %701 = math.rsqrt %700 : vector<2x1xf32>
    %702 = vector.broadcast %701 : vector<2x1xf32> to vector<2x32xf32>
    %703 = arith.mulf %698, %702 : vector<2x32xf32>
    %704 = vector.broadcast %673 : vector<1x32xf32> to vector<2x32xf32>
    %705 = arith.mulf %703, %704 : vector<2x32xf32>
    %706 = vector.broadcast %674 : vector<1x32xf32> to vector<2x32xf32>
    %707 = arith.addf %705, %706 : vector<2x32xf32>
    %c0_117 = arith.constant 0 : index
    %c0_118 = arith.constant 0 : index
    %708 = vector.load %arg6[%c0_117, %c0_118] : memref<96x128xf32, #tpu.memory_space<vmem>>, vector<96x128xf32>
    %709 = vector.extract_strided_slice %708 {offsets = [0, 0], sizes = [32, 64], strides = [1, 1]} : vector<96x128xf32> to vector<32x64xf32>
    %710 = vector.extract_strided_slice %708 {offsets = [32, 0], sizes = [64, 128], strides = [1, 1]} : vector<96x128xf32> to vector<64x128xf32>
    %711 = vector.extract_strided_slice %671 {offsets = [3, 0], sizes = [1, 64], strides = [1, 1]} : vector<5x128xf32> to vector<1x64xf32>
    %712 = vector.extract_strided_slice %671 {offsets = [4, 0], sizes = [1, 128], strides = [1, 1]} : vector<5x128xf32> to vector<1x128xf32>
    %cst_119 = arith.constant dense<0.000000e+00> : vector<2x64xf32>
    %713 = tpu.matmul %707, %709, %cst_119 {dimension_numbers = #tpu.dot_dimension_numbers<[1], [0], [0], [1], [0, 0, 1, 1], [], []>} : vector<2x32xf32>, vector<32x64xf32>, vector<2x64xf32> -> vector<2x64xf32>
    %714 = vector.broadcast %711 : vector<1x64xf32> to vector<2x64xf32>
    %715 = arith.addf %713, %714 : vector<2x64xf32>
    %cst_120 = arith.constant 0.000000e+00 : f32
    %716 = vector.broadcast %cst_120 : f32 to vector<2x64xf32>
    %717 = arith.cmpf oge, %715, %716 : vector<2x64xf32>
    %cst_121 = arith.constant 0.00999999977 : f32
    %718 = vector.broadcast %cst_121 : f32 to vector<2x64xf32>
    %719 = arith.mulf %718, %715 : vector<2x64xf32>
    %720 = arith.select %717, %715, %719 : vector<2x64xi1>, vector<2x64xf32>
    %cst_122 = arith.constant dense<0.000000e+00> : vector<2x128xf32>
    %721 = tpu.matmul %720, %710, %cst_122 {dimension_numbers = #tpu.dot_dimension_numbers<[1], [0], [0], [1], [0, 0, 1, 1], [], []>} : vector<2x64xf32>, vector<64x128xf32>, vector<2x128xf32> -> vector<2x128xf32>
    %722 = vector.broadcast %712 : vector<1x128xf32> to vector<2x128xf32>
    %723 = arith.addf %721, %722 : vector<2x128xf32>
    %724 = tpu.iota {dimensions = array<i32: 1>} : vector<2x128xi32>
    %c2_i32 = arith.constant 2 : i32
    %725 = vector.broadcast %c2_i32 : i32 to vector<2x128xi32>
    %726 = arith.cmpi slt, %724, %725 : vector<2x128xi32>
    %cst_123 = arith.constant -1.000000e+30 : f32
    %727 = vector.broadcast %cst_123 : f32 to vector<2x128xf32>
    %728 = arith.select %726, %723, %727 : vector<2x128xi1>, vector<2x128xf32>
    %cst_124 = arith.constant dense<0xFF800000> : vector<2xf32>
    %729 = vector.multi_reduction <maximumf>, %728, %cst_124 [1] : vector<2x128xf32> to vector<2xf32>
    %730 = vector.shape_cast %729 : vector<2xf32> to vector<2x1xf32>
    %731 = vector.broadcast %730 : vector<2x1xf32> to vector<2x128xf32>
    %732 = arith.subf %728, %731 : vector<2x128xf32>
    %733 = math.exp %732 : vector<2x128xf32>
    %cst_125 = arith.constant dense<0.000000e+00> : vector<2xf32>
    %734 = vector.multi_reduction <add>, %733, %cst_125 [1] : vector<2x128xf32> to vector<2xf32>
    %735 = vector.shape_cast %734 : vector<2xf32> to vector<2x1xf32>
    %736 = vector.broadcast %735 : vector<2x1xf32> to vector<2x128xf32>
    %737 = arith.divf %733, %736 : vector<2x128xf32>
    %c2_i32_126 = arith.constant 2 : i32
    %738 = vector.broadcast %c2_i32_126 : i32 to vector<2x128xi32>
    %739 = arith.cmpi eq, %724, %738 : vector<2x128xi32>
    %cst_127 = arith.constant 0.000000e+00 : f32
    %740 = vector.broadcast %cst_127 : f32 to vector<2x128xf32>
    %741 = arith.select %739, %723, %740 : vector<2x128xi1>, vector<2x128xf32>
    %742 = arith.select %726, %737, %741 : vector<2x128xi1>, vector<2x128xf32>
    %c0_128 = arith.constant 0 : index
    %c0_129 = arith.constant 0 : index
    %743 = vector.load %arg8[%c0_128, %c0_129] : memref<2x128xf32, #tpu.memory_space<vmem>>, vector<2x128xf32>
    tpu.vector_store %arg8[%c0_128, %c0_129], %742 {strides = array<i32>} : memref<2x128xf32, #tpu.memory_space<vmem>>, vector<2x128xf32>,
    return
  }
}

</mosaic_0001>

<bundles_post_ra>
// kernel: agent_forward.1
= control target key start
LH: loop header
LB: loop body
LE: loop exit
PB: predicated region body
PF: predicated region fallthrough
CT: control target
= control target key end

     0   :  { %vm49_vm0 = vcmask 261120   ;;  %s1820_s28 = smov 64   ;;  %v1821_v15 = vmov 0.0   ;;  %s1823_s21 = smov 96   ;;  %s2476_s3 = inlined_call_operand.vmem [shape: f32[128,96], index: 3, kind: input, shape index: {}]   ;;  %s2477_s4 = inlined_call_operand.vmem [shape: f32[4,96], index: 4, kind: input, shape index: {}]   ;;  %s2478_s0 = inlined_call_operand.vmem [shape: f32[16,32], index: 0, kind: input, shape index: {}]   ;;  %s2479_s2 = inlined_call_operand.vmem [shape: f32[2,1], index: 2, kind: input, shape index: {}]   ;;  %s2480_s5 = inlined_call_operand.vmem [shape: f32[96,32], index: 5, kind: input, shape index: {}]   ;;  %s2481_s1 = inlined_call_operand.vmem [shape: f32[2,32], index: 1, kind: input, shape index: {}]   ;;  %s2482_s7 = inlined_call_operand.vmem [shape: f32[5,128], index: 7, kind: input, shape index: {}]   ;;  %s2483_s6 = inlined_call_operand.vmem [shape: f32[96,128], index: 6, kind: input, shape index: {}]   ;;  %s2484_s8 = inlined_call_operand.vmem [shape: f32[2,128], index: 8, kind: output, shape index: {}]  }
   0x1   :  { %v1874_v0 = vld [vmem:[%s2476_s3 + $0x58] sm:$0xff]  ;;  %v1879_v1 = vld [vmem:[%s2476_s3 + $0x50] sm:$0xff]  ;;  %v1891_v4 = vld [vmem:[%s2476_s3 + $0x48] sm:$0xff] }
   0x2   :  { %v32_v2 = vld [vmem:[%s2476_s3 + $0x18] sm:$0xff]  ;;  %130 = vmatpush.msra.mxu2 %v1874_v0  ;;  %v31_v3 = vld [vmem:[%s2476_s3 + $0x10] sm:$0xff]  ;;  %v30_v5 = vld [vmem:[%s2476_s3 + $0x8] sm:$0xff] }
   0x3   :  { %68 = vmatpush.msra.mxu0 %v32_v2  ;;  %1702 = vmatpush.msra.mxu1 %v32_v2  ;;  %v1900_v6 = vld [vmem:[%s2477_s4] sm:$0xf]  ;;  %v1905_v7 = vld [vmem:[%s2476_s3 + $0x78] sm:$0xff]  ;;  %v1910_v8 = vld [vmem:[%s2476_s3 + $0x70] sm:$0xff] }
   0x4   :  { %131 = vmatpush.msra.mxu2 %v1879_v1  ;;  %v1915_v9 = vld [vmem:[%s2476_s3 + $0x40] sm:$0xff]  ;;  %v178_v11 = vperm.slane %v1900_v6, 2  ;;  %150 = vmatpush.msra.mxu3 %v1905_v7  ;;  %v231_v13 = vperm.slane %v1900_v6, 3  ;;  %v1932_v14 = vld [vmem:[%s2476_s3 + $0x68] sm:$0xff]  ;;  %v36_v18 = vld [vmem:[%s2476_s3 + $0x38] sm:$0xff]  ;;  %v48_v22 = vperm.slane %v1900_v6, 0 }
   0x5   :  { %69 = vmatpush.msra.mxu0 %v31_v3  ;;  %v29_v10 = vld [vmem:[%s2476_s3] sm:$0xff]  ;;  %1703 = vmatpush.msra.mxu1 %v31_v3  ;;  %v47_v17 = vld [vmem:[%s2478_s0 + $0x8] sm:$0xff]  ;;  %v35_v19 = vld [vmem:[%s2476_s3 + $0x30] sm:$0xff]  ;;  %v79_v31 = vperm.slane %v1900_v6, 1 }
   0x6   :  { %132 = vmatpush.msra.mxu2 %v1891_v4  ;;  %v46_v12 = vld [vmem:[%s2478_s0] sm:$0xff]  ;;  %180 = vrot.lane.b32.xlu0 %v178_v11, %s1820_s28  ;;  %v34_v20 = vld [vmem:[%s2476_s3 + $0x28] sm:$0xff] }
   0x7   :  { %70 = vmatpush.msra.mxu0 %v30_v5  ;;  %151 = vmatpush.msra.mxu3 %v1910_v8  ;;  %v1940_v16 = vld [vmem:[%s2476_s3 + $0x60] sm:$0xff] }
   0x8   :  { %133 = vmatpush.msra.mxu2 %v1915_v9  ;;  %233 = vrot.lane.b32.xlu1 %v231_v13, %s1820_s28  ;;  %v33_v21 = vld [vmem:[%s2476_s3 + $0x20] sm:$0xff] }
   0x9   :  { %71 = vmatpush.msra.mxu0 %v29_v10  ;;  %134 = vmatmul.f32.vlgmr.msra.gmra.mxu2 %v1821_v15 }
   0xa   :  { %1655 = vmatmul.msk.f32.vlgmr.msra.gmra.mxu0 %vm49_vm0, %v46_v12  ;;  %152 = vmatpush.msra.mxu3 %v1932_v14 }
   0xb   :  { %1704 = vmatpush.msra.mxu1 %v30_v5  ;;  %290 = vmatpush.msrb.mxu2 %v1874_v0 }
   0xc   :  { %153 = vmatpush.msra.mxu3 %v1940_v16  ;;  %464 = vmatpush.msrb.mxu0 %v1874_v0 }
   0xd   :  { %154 = vmatmul.f32.vlgmr.msra.gmra.mxu3 %v1821_v15  ;;  %1705 = vmatpush.msra.mxu1 %v29_v10 }
   0xe   :  { %1656 = vmatmul.msk.f32.vlgmr.msra.gmra.mxu1 %vm49_vm0, %v47_v17  ;;  %291 = vmatpush.msrb.mxu2 %v1879_v1 }
   0xf   :  { %92 = vmatpush.msrb.mxu1 %v36_v18  ;;  %313 = vmatpush.msrb.mxu3 %v1905_v7  ;;  %v1822_v18 = vmov 0  }
  0x10   :  { %292 = vmatpush.msrb.mxu2 %v1891_v4  ;;  %465 = vmatpush.msrb.mxu0 %v1879_v1 }
  0x11   :  { %93 = vmatpush.msrb.mxu1 %v35_v19  ;;  %314 = vmatpush.msrb.mxu3 %v1910_v8 }
  0x12   :  { %293 = vmatpush.msrb.mxu2 %v1915_v9  ;;  %466 = vmatpush.msrb.mxu0 %v1891_v4 }
  0x13   :  { %94 = vmatpush.msrb.mxu1 %v34_v20  ;;  %315 = vmatpush.msrb.mxu3 %v1932_v14 }
  0x14   :  { %467 = vmatpush.msrb.mxu0 %v1915_v9  ;;  %636 = vmatpush.msra.mxu2 %v1874_v0 }
  0x15   :  { %95 = vmatpush.msrb.mxu1 %v33_v21  ;;  %316 = vmatpush.msrb.mxu3 %v1940_v16 }
  0x16   :  { %1657 = vmatmul.msk.f32.vlgmr.msrb.gmra.mxu1 %vm49_vm0, %v46_v12  ;;  %637 = vmatpush.msra.mxu2 %v1879_v1 }
  0x17   :  { %487 = vmatpush.msra.mxu1 %v1905_v7  ;;  %659 = vmatpush.msra.mxu3 %v1905_v7 }
  0x18   :  { %638 = vmatpush.msra.mxu2 %v1891_v4  ;;  %800 = vmatpush.msra.mxu0 %v1874_v0 }
  0x19   :  { %488 = vmatpush.msra.mxu1 %v1910_v8  ;;  %660 = vmatpush.msra.mxu3 %v1910_v8 }
  0x1a   :  { %639 = vmatpush.msra.mxu2 %v1915_v9  ;;  %801 = vmatpush.msra.mxu0 %v1879_v1 }
  0x1b   :  { %489 = vmatpush.msra.mxu1 %v1932_v14  ;;  %661 = vmatpush.msra.mxu3 %v1932_v14 }
  0x1c   :  { %802 = vmatpush.msra.mxu0 %v1891_v4  ;;  %1712 = vset.pattern.permute.xlu2 %v1822_v18 }
  0x1d   :  { %490 = vmatpush.msra.mxu1 %v1940_v16  ;;  %662 = vmatpush.msra.mxu3 %v1940_v16 }
  0x1e   :  { %1658 = vmatmul.msk.f32.gmra.mxu1 %vm49_vm0, %v47_v17  ;;  %803 = vmatpush.msra.mxu0 %v1915_v9  ;;  %v103_v17 = vld [vmem:[%s2479_s2] sm:$0x3]  ;;  %s1824_s2 = smov 32  }
  0x1f   :  { %825 = vmatpush.msrb.mxu1 %v1905_v7  ;;  %1713 = vset.pattern.permute.xlu0 %v1822_v18 }
  0x21   :  { %826 = vmatpush.msrb.mxu1 %v1910_v8 }
  0x23   :  { %827 = vmatpush.msrb.mxu1 %v1932_v14 }
  0x25   :  { %828 = vmatpush.msrb.mxu1 %v1940_v16 }
  0x78   :  { %v1997_v23 = vpop.permute.xlu0 %180 }
  0x7a   :  { %v2002_v28 = vpop.permute.xlu1 %233 }
  0x87   :  { %v73_v35 = vpop.f32.mrf.mxu0 }
  0x88   :  { %v2010_v36 = vadd.f32 %v73_v35, %v48_v22 }
  0x8b   :  { %v76_v24 = vpop.f32.mrf.mxu1 }
  0x8c   :  { %v135_v25 = vpop.f32.mrf.mxu2  ;;  %v1999_v26 = vadd.f32 %v76_v24, %v48_v22 }
  0x8d   :  { %v183_v27 = vadd.f32 %v1997_v23, %v135_v25  ;;  %v158_v38 = vadd.f32 %v135_v25, %v2010_v36 }
  0x8f   :  { %185 = vrot.lane.b32.xlu0 %v183_v27, %s1820_s28  ;;  %v1661_v41 = vmul.f32 -1.442695, %v158_v38 }
  0x90   :  { %v155_v29 = vpop.f32.mrf.mxu3 }
  0x91   :  { %v236_v30 = vadd.f32 %v2002_v28, %v155_v29  ;;  %v209_v39 = vrot.slane %v155_v29, 2  ;;  %1714 = vpow2.f32 %v1661_v41 }
  0x93   :  { %v238_v32 = vrot.slane %v236_v30, 2  ;;  %v97_v33 = vpop.f32.mrf.mxu1 }
  0x94   :  { %v2007_v34 = vadd.f32 %v97_v33, %v79_v31 }
  0x95   :  { %239 = vrot.lane.b32.xlu2 %v238_v32, %s1820_s28 }
  0x97   :  { %v1715_v44 = vpop.eup %1714 }
  0x98   :  { %v162_v45 = vadd.f32 1.0, %v1715_v44 }
  0x9a   :  { %v174_v57 = vand.u32 2147483648, %v162_v45  ;;  %vm168_vm2 = vweird.f32 %v162_v45  ;;  %v172_v58 = vand.u32 2147483647, %v162_v45 }
  0x9b   :  { %v100_v37 = vpop.f32.mrf.mxu1 }
  0x9c   :  { %v2013_v40 = vadd.f32 %v100_v37, %v79_v31  ;;  %v175_v63 = vor.u32 1.1754944e-38, %v174_v57  ;;  %vm173_vm7 = vcmp.eq.f32.partialorder %v172_v58, 8.507059e+37 }
  0x9d   :  { %106 = vperm.xlu2 %1712, %v103_v17  }
  0x9e   :  { %v211_v42 = vadd.f32 %v209_v39, %v2013_v40 }
  0xa0   :  { %v1662_v43 = vmul.f32 -1.442695, %v211_v42 }
  0xa2   :  { %1716 = vpow2.f32 %v1662_v43 }
  0xa3   :  { %1718 = vrcp.f32 %v162_v45 }
  0xa8   :  { %v1717_v46 = vpop.eup %1716 }
  0xa9   :  { %v215_v47 = vadd.f32 1.0, %v1717_v46  ;;  %v1719_v48 = vpop.eup %1718 }
  0xaa   :  { %v164_v49 = vmul.f32 %v1719_v48, %v162_v45  ;;  %vm169_vm1 = vweird.f32 %v1719_v48 }
  0xab   :  { %1720 = vrcp.f32 %v215_v47  ;;  %vm221_vm3 = vweird.f32 %v215_v47  ;;  %vm170_vm5 = vmor %vm168_vm2, %vm169_vm1  ;;  %v227_v59 = vand.u32 2147483648, %v215_v47  ;;  %v225_v62 = vand.u32 2147483647, %v215_v47 }
  0xac   :  { %v165_v51 = vsub.f32 1.0, %v164_v49 }
  0xad   :  { %v228_v5 = vor.u32 1.1754944e-38, %v227_v59  ;;  %vm226_vm8 = vcmp.eq.f32.partialorder %v225_v62, 8.507059e+37 }
  0xae   :  { %v166_v53 = vmul.f32 %v1719_v48, %v165_v51 }
  0xb0   :  { %v167_v55 = vadd.f32 %v1719_v48, %v166_v53 }
  0xb1   :  { %v1721_v50 = vpop.eup %1720 }
  0xb2   :  { %v217_v52 = vmul.f32 %v1721_v50, %v215_v47  ;;  %vm222_vm4 = vweird.f32 %v1721_v50  ;;  %v171_v60 = vsel %vm170_vm5, %v1719_v48, %v167_v55 }
  0xb3   :  { %vm223_vm6 = vmor %vm221_vm3, %vm222_vm4  ;;  %v176_v3 = vsel %vm173_vm7, %v175_v63, %v171_v60 }
  0xb4   :  { %v218_v54 = vsub.f32 1.0, %v217_v52  ;;  %v195_v30 = vsub.f32 1.0, %v176_v3  ;;  %v201_v33 = vmul.f32 0.0, %v176_v3 }
  0xb6   :  { %v219_v56 = vmul.f32 %v1721_v50, %v218_v54 }
  0xb8   :  { %v220_v61 = vadd.f32 %v1721_v50, %v219_v56 }
  0xba   :  { %v224_v10 = vsel %vm223_vm6, %v1721_v50, %v220_v61 }
  0xbb   :  { %v229_v12 = vsel %vm226_vm8, %v228_v5, %v224_v10 }
  0xbc   :  { %v249_v41 = vsub.f32 1.0, %v229_v12  ;;  %v255_v44 = vmul.f32 0.0, %v229_v12 }
  0xef   :  { %v240_v11 = vpop.permute.xlu2 %239 }
  0xf0   :  { %v242_v13 = vmul.f32 %v240_v11, %v229_v12 }
  0xf7   :  { %v2025_v27 = vpop.permute.xlu2 %106 }
  0xf8   :  { %vm109_vm9 = vcmp.gt.f32.partialorder %v2025_v27, 0.0  ;;  %vm112_vm10 = vcmp.gt.f32.partialorder %v2025_v27, 7.0  ;;  %vm267_vm4 = vcmp.gt.f32.partialorder %v2025_v27, 1.0  ;;  %vm270_vm5 = vcmp.gt.f32.partialorder %v2025_v27, 6.0 }
  0xf9   :  { %v2029_v29 = vsel %vm109_vm9, 1.0, %v1821_v15  ;;  %v2048_v49 = vsel %vm112_vm10, 1.0, %v1821_v15 }
  0xfa   :  { %v204_v31 = vsub.f32 1.0, %v2029_v29  ;;  %v263_v50 = vsub.f32 1.0, %v2048_v49 }
  0xfc   :  { %v205_v38 = vmul.f32 0.0, %v204_v31  ;;  %v264_v52 = vmul.f32 0.0, %v263_v50 }
 0x101   :  { %v186_v2 = vpop.permute.xlu0 %185 }
 0x102   :  { %v188_v6 = vmul.f32 %v186_v2, %v176_v3 }
 0x104   :  { %190 = vrot.lane.b32.xlu1 %v188_v6, %s1820_s28 }
 0x10c   :  { %244 = vrot.lane.b32.xlu1 %v242_v13, %s1820_s28 }
 0x176   :  { %v191_v19 = vpop.permute.xlu1 %190 }
 0x177   :  { %v193_v20 = vadd.f32 %v191_v19, %v2010_v36 }
 0x179   :  { %1722 = vtanh.f32 %v193_v20 }
 0x17e   :  { %v245_v21 = vpop.permute.xlu1 %244 }
 0x17f   :  { %v1723_v22 = vpop.eup %1722  ;;  %v247_v24 = vadd.f32 %v245_v21, %v2013_v40 }
 0x180   :  { %197 = vrot.lane.b32.xlu0 %v1723_v22, %s1823_s21 }
 0x181   :  { %1724 = vtanh.f32 %v247_v24 }
 0x187   :  { %v1725_v25 = vpop.eup %1724 }
 0x188   :  { %251 = vrot.lane.b32.xlu0 %v1725_v25, %s1823_s21 }
 0x1f2   :  { %v198_v32 = vpop.permute.xlu0 %197 }
 0x1f3   :  { %v200_v35 = vmul.f32 %v198_v32, %v195_v30 }
 0x1f5   :  { %v202_v37 = vadd.f32 %v201_v33, %v200_v35 }
 0x1f7   :  { %v2033_v39 = vmul.f32 %v2029_v29, %v202_v37 }
 0x1f9   :  { %v2036_v42 = vadd.f32 %v205_v38, %v2033_v39 }
 0x1fa   :  { %v252_v43 = vpop.permute.xlu0 %251 }
 0x1fb   :  { %v254_v45 = vmul.f32 %v252_v43, %v249_v41  ;;  %274 = vrot.lane.b32.xlu2 %v2036_v42, %s1823_s21  ;;  %v363_v17 = vrot.slane %v2036_v42, 6 }
 0x1fd   :  { %v256_v46 = vadd.f32 %v255_v44, %v254_v45 }
 0x1ff   :  { %v258_v47 = vrot.slane %v256_v46, 6 }
 0x201   :  { %259 = vrot.lane.b32.xlu1 %v258_v47, %s1823_s21 }
 0x255   :  { %v275_v48 = vpop.permute.xlu2 %274 }
 0x256   :  { %1665 = vmatmul.msk.f32.vlgmr.msrb.gmra.mxu2 %vm49_vm0, %v275_v48 }
 0x257   :  { %960 = vmatpush.msrb.mxu2 %v1874_v0 }
 0x259   :  { %961 = vmatpush.msrb.mxu2 %v1879_v1 }
 0x25b   :  { %962 = vmatpush.msrb.mxu2 %v1891_v4 }
 0x25d   :  { %963 = vmatpush.msrb.mxu2 %v1915_v9 }
 0x273   :  { %v260_v51 = vpop.permute.xlu1 %259 }
 0x274   :  { %v2052_v53 = vmul.f32 %v2048_v49, %v260_v51 }
 0x276   :  { %v2055_v54 = vadd.f32 %v264_v52, %v2052_v53 }
 0x278   :  { %1666 = vmatmul.msk.f32.vlgmr.msrb.gmra.mxu3 %vm49_vm0, %v2055_v54 }
 0x279   :  { %983 = vmatpush.msrb.mxu3 %v1905_v7 }
 0x27b   :  { %984 = vmatpush.msrb.mxu3 %v1910_v8 }
 0x27d   :  { %985 = vmatpush.msrb.mxu3 %v1932_v14 }
 0x27f   :  { %986 = vmatpush.msrb.mxu3 %v1940_v16 }
 0x2d9   :  { %v295_v55 = vpop.f32.mrf.mxu2 }
 0x2da   :  { %v322_v56 = vrot.slane %v295_v55, 6  ;;  %v344_v57 = vadd.f32 %v295_v55, %v1997_v23 }
 0x2dc   :  { %v324_v58 = vadd.f32 %v322_v56, %v2010_v36  ;;  %v346_v59 = vrot.slane %v344_v57, 6 }
 0x2de   :  { %v1667_v60 = vmul.f32 -1.442695, %v324_v58  ;;  %347 = vrot.lane.b32.xlu2 %v346_v59, %s1820_s28  ;;  %v2076_v58 = vsel %vm267_vm4, 1.0, %v1821_v15 }
 0x2df   :  { %v373_v59 = vsub.f32 1.0, %v2076_v58 }
 0x2e0   :  { %1726 = vpow2.f32 %v1667_v60 }
 0x2e1   :  { %v374_v60 = vmul.f32 %v373_v59, %v2036_v42 }
 0x2e6   :  { %v1727_v61 = vpop.eup %1726 }
 0x2e7   :  { %v328_v62 = vadd.f32 1.0, %v1727_v61 }
 0x2e9   :  { %1728 = vrcp.f32 %v328_v62  ;;  %v340_v5 = vand.u32 2147483648, %v328_v62  ;;  %v338_v10 = vand.u32 2147483647, %v328_v62  ;;  %vm334_vm12 = vweird.f32 %v328_v62 }
 0x2eb   :  { %v341_v12 = vor.u32 1.1754944e-38, %v340_v5  ;;  %vm339_vm14 = vcmp.eq.f32.partialorder %v338_v10, 8.507059e+37 }
 0x2ef   :  { %v1729_v63 = vpop.eup %1728 }
 0x2f0   :  { %v330_v2 = vmul.f32 %v1729_v63, %v328_v62  ;;  %vm335_vm11 = vweird.f32 %v1729_v63 }
 0x2f1   :  { %vm336_vm13 = vmor %vm334_vm12, %vm335_vm11 }
 0x2f2   :  { %v331_v3 = vsub.f32 1.0, %v330_v2 }
 0x2f4   :  { %v332_v6 = vmul.f32 %v1729_v63, %v331_v3 }
 0x2f6   :  { %v333_v11 = vadd.f32 %v1729_v63, %v332_v6 }
 0x2f8   :  { %v337_v13 = vsel %vm336_vm13, %v1729_v63, %v333_v11  ;;  %v427_v11 = vrot.slane %v2055_v54, 4 }
 0x2f9   :  { %v342_v18 = vsel %vm339_vm14, %v341_v12, %v337_v13  ;;  %vm443_vm14 = vcmp.gt.f32.partialorder %v2025_v27, 2.0 }
 0x2fa   :  { %v365_v19 = vmul.f32 %v363_v17, %v342_v18  ;;  %v357_v2 = vsub.f32 1.0, %v342_v18 }
 0x2fb   :  { %v318_v20 = vpop.f32.mrf.mxu3 }
 0x2fc   :  { %v408_v21 = vadd.f32 %v318_v20, %v2002_v28  ;;  %v386_v30 = vrot.slane %v318_v20, 4 }
 0x2fe   :  { %v410_v22 = vrot.slane %v408_v21, 4  ;;  %v388_v31 = vadd.f32 %v386_v30, %v2013_v40  ;;  %v2103_v30 = vsel %vm270_vm5, 1.0, %v1821_v15 }
 0x300   :  { %411 = vrot.lane.b32.xlu1 %v410_v22, %s1820_s28  ;;  %v1668_v32 = vmul.f32 -1.442695, %v388_v31  ;;  %v439_v31 = vsub.f32 1.0, %v2103_v30 }
 0x302   :  { %1730 = vpow2.f32 %v1668_v32 }
 0x308   :  { %v1731_v33 = vpop.eup %1730 }
 0x309   :  { %v392_v35 = vadd.f32 1.0, %v1731_v33  ;;  %v440_v33 = vmul.f32 %v439_v31, %v2055_v54 }
 0x30b   :  { %1732 = vrcp.f32 %v392_v35  ;;  %v404_v45 = vand.u32 2147483648, %v392_v35  ;;  %vm398_vm1 = vweird.f32 %v392_v35  ;;  %v402_v46 = vand.u32 2147483647, %v392_v35 }
 0x30d   :  { %v405_v48 = vor.u32 1.1754944e-38, %v404_v45  ;;  %vm403_vm3 = vcmp.eq.f32.partialorder %v402_v46, 8.507059e+37 }
 0x311   :  { %v1733_v37 = vpop.eup %1732 }
 0x312   :  { %v394_v38 = vmul.f32 %v1733_v37, %v392_v35  ;;  %vm399_vm15 = vweird.f32 %v1733_v37 }
 0x313   :  { %vm400_vm2 = vmor %vm398_vm1, %vm399_vm15  ;;  %vm446_vm15 = vcmp.gt.f32.partialorder %v2025_v27, 5.0 }
 0x314   :  { %v395_v41 = vsub.f32 1.0, %v394_v38 }
 0x316   :  { %v396_v43 = vmul.f32 %v1733_v37, %v395_v41 }
 0x318   :  { %v397_v44 = vadd.f32 %v1733_v37, %v396_v43 }
 0x31a   :  { %v401_v47 = vsel %vm400_vm2, %v1733_v37, %v397_v44 }
 0x31b   :  { %v406_v51 = vsel %vm403_vm3, %v405_v48, %v401_v47 }
 0x338   :  { %v348_v24 = vpop.permute.xlu2 %347 }
 0x339   :  { %v350_v25 = vmul.f32 %v348_v24, %v342_v18 }
 0x33b   :  { %352 = vrot.lane.b32.xlu0 %v350_v25, %s1820_s28 }
 0x372   :  { %v412_v50 = vpop.permute.xlu1 %411 }
 0x373   :  { %v414_v52 = vmul.f32 %v412_v50, %v406_v51 }
 0x375   :  { %416 = vrot.lane.b32.xlu0 %v414_v52, %s1820_s28 }
 0x3ad   :  { %v353_v55 = vpop.permute.xlu0 %352 }
 0x3ae   :  { %v355_v56 = vadd.f32 %v353_v55, %v2010_v36 }
 0x3b0   :  { %1734 = vtanh.f32 %v355_v56 }
 0x3b6   :  { %v1735_v57 = vpop.eup %1734 }
 0x3b7   :  { %359 = vrot.lane.b32.xlu2 %v1735_v57, %s1823_s21 }
 0x3bf   :  { %376 = vrot.lane.b32.xlu2 %v374_v60, %s1823_s21 }
 0x3e7   :  { %v417_v61 = vpop.permute.xlu0 %416 }
 0x3e8   :  { %v419_v62 = vadd.f32 %v417_v61, %v2013_v40 }
 0x3ea   :  { %1736 = vtanh.f32 %v419_v62 }
 0x3f0   :  { %v1737_v63 = vpop.eup %1736 }
 0x3f1   :  { %423 = vrot.lane.b32.xlu0 %v1737_v63, %s1823_s21 }
 0x411   :  { %v360_v3 = vpop.permute.xlu2 %359 }
 0x412   :  { %v362_v5 = vmul.f32 %v360_v3, %v357_v2 }
 0x414   :  { %v366_v6 = vadd.f32 %v365_v19, %v362_v5  ;;  %v421_v19 = vsub.f32 1.0, %v406_v51 }
 0x416   :  { %v368_v10 = vrot.slane %v366_v6, 2 }
 0x418   :  { %369 = vrot.lane.b32.xlu1 %v368_v10, %s1823_s21 }
 0x419   :  { %v377_v13 = vpop.permute.xlu2 %376 }
 0x420   :  { %428 = vrot.lane.b32.xlu1 %v427_v11, %s1824_s2 }
 0x463   :  { %v424_v18 = vpop.permute.xlu0 %423 }
 0x464   :  { %v426_v21 = vmul.f32 %v424_v18, %v421_v19 }
 0x48a   :  { %v370_v42 = vpop.permute.xlu1 %369 }
 0x48b   :  { %v2089_v12 = vmul.f32 %v2076_v58, %v370_v42 }
 0x48d   :  { %v2092_v17 = vadd.f32 %v377_v13, %v2089_v12 }
 0x48f   :  { %1671 = vmatmul.msk.f32.vlgmr.msrb.gmra.mxu0 %vm49_vm0, %v2092_v17  ;;  %v537_v10 = vrot.slane %v2092_v17, 4 }
 0x490   :  { %1126 = vmatpush.msrb.mxu0 %v1874_v0 }
 0x492   :  { %v429_v20 = vpop.permute.xlu1 %428  ;;  %1127 = vmatpush.msrb.mxu0 %v1879_v1 }
 0x493   :  { %v431_v22 = vmul.f32 %v429_v20, %v406_v51 }
 0x494   :  { %1128 = vmatpush.msrb.mxu0 %v1891_v4 }
 0x495   :  { %v432_v24 = vadd.f32 %v431_v22, %v426_v21 }
 0x496   :  { %1129 = vmatpush.msrb.mxu0 %v1915_v9 }
 0x497   :  { %v434_v25 = vrot.slane %v432_v24, 4 }
 0x499   :  { %435 = vrot.lane.b32.xlu2 %v434_v25, %s1823_s21 }
 0x4f3   :  { %v436_v32 = vpop.permute.xlu2 %435 }
 0x4f4   :  { %v2110_v35 = vmul.f32 %v2103_v30, %v436_v32 }
 0x4f6   :  { %v2113_v37 = vadd.f32 %v440_v33, %v2110_v35 }
 0x4f8   :  { %1672 = vmatmul.msk.f32.vlgmr.msra.gmra.mxu1 %vm49_vm0, %v2113_v37 }
 0x4f9   :  { %1149 = vmatpush.msra.mxu1 %v1905_v7 }
 0x4fb   :  { %1150 = vmatpush.msra.mxu1 %v1910_v8 }
 0x4fd   :  { %1151 = vmatpush.msra.mxu1 %v1932_v14 }
 0x4ff   :  { %1152 = vmatpush.msra.mxu1 %v1940_v16 }
 0x50c   :  { %v469_v38 = vpop.f32.mrf.mxu0 }
 0x50d   :  { %v518_v54 = vadd.f32 %v469_v38, %v1997_v23  ;;  %v496_v43 = vrot.slane %v469_v38, 4 }
 0x50f   :  { %v520_v41 = vrot.slane %v518_v54, 4  ;;  %v498_v44 = vadd.f32 %v496_v43, %v2010_v36 }
 0x511   :  { %521 = vrot.lane.b32.xlu0 %v520_v41, %s1820_s28  ;;  %v1673_v45 = vmul.f32 -1.442695, %v498_v44 }
 0x513   :  { %1738 = vpow2.f32 %v1673_v45  ;;  %v599_v45 = vrot.slane %v2113_v37, 6 }
 0x519   :  { %v1739_v46 = vpop.eup %1738 }
 0x51a   :  { %v502_v47 = vadd.f32 1.0, %v1739_v46 }
 0x51c   :  { %1740 = vrcp.f32 %v502_v47  ;;  %v514_v61 = vand.u32 2147483648, %v502_v47  ;;  %vm508_vm7 = vweird.f32 %v502_v47  ;;  %v512_v62 = vand.u32 2147483647, %v502_v47 }
 0x51e   :  { %v515_v2 = vor.u32 1.1754944e-38, %v514_v61  ;;  %vm513_vm9 = vcmp.eq.f32.partialorder %v512_v62, 8.507059e+37 }
 0x522   :  { %v1741_v48 = vpop.eup %1740 }
 0x523   :  { %v504_v50 = vmul.f32 %v1741_v48, %v502_v47  ;;  %vm509_vm6 = vweird.f32 %v1741_v48 }
 0x524   :  { %vm510_vm8 = vmor %vm508_vm7, %vm509_vm6 }
 0x525   :  { %v505_v51 = vsub.f32 1.0, %v504_v50 }
 0x527   :  { %v506_v57 = vmul.f32 %v1741_v48, %v505_v51 }
 0x529   :  { %v507_v60 = vadd.f32 %v1741_v48, %v506_v57 }
 0x52b   :  { %v511_v63 = vsel %vm510_vm8, %v1741_v48, %v507_v60 }
 0x52c   :  { %v516_v3 = vsel %vm513_vm9, %v515_v2, %v511_v63  ;;  %vm618_vm9 = vcmp.gt.f32.partialorder %v2025_v27, 4.0 }
 0x575   :  { %v492_v52 = vpop.f32.mrf.mxu1 }
 0x576   :  { %v580_v55 = vadd.f32 %v492_v52, %v2002_v28  ;;  %v558_v11 = vrot.slane %v492_v52, 6 }
 0x578   :  { %v582_v56 = vrot.slane %v580_v55, 6  ;;  %v560_v42 = vadd.f32 %v558_v11, %v2013_v40 }
 0x57a   :  { %583 = vrot.lane.b32.xlu2 %v582_v56, %s1820_s28  ;;  %v1674_v13 = vmul.f32 -1.442695, %v560_v42  ;;  %v531_v56 = vsub.f32 1.0, %v516_v3 }
 0x57c   :  { %1742 = vpow2.f32 %v1674_v13 }
 0x582   :  { %v1743_v18 = vpop.eup %1742 }
 0x583   :  { %v522_v5 = vpop.permute.xlu0 %521  ;;  %v564_v19 = vadd.f32 1.0, %v1743_v18  ;;  %v2141_v18 = vsel %vm443_vm14, 1.0, %v1821_v15 }
 0x584   :  { %v524_v6 = vmul.f32 %v522_v5, %v516_v3 }
 0x585   :  { %1744 = vrcp.f32 %v564_v19  ;;  %v576_v32 = vand.u32 2147483648, %v564_v19  ;;  %vm570_vm11 = vweird.f32 %v564_v19  ;;  %v574_v33 = vand.u32 2147483647, %v564_v19 }
 0x586   :  { %526 = vrot.lane.b32.xlu1 %v524_v6, %s1820_s28 }
 0x587   :  { %v577_v54 = vor.u32 1.1754944e-38, %v576_v32  ;;  %vm575_vm13 = vcmp.eq.f32.partialorder %v574_v33, 8.507059e+37  ;;  %v442_v32 = vadd.f32 %v2110_v35, %v2052_v53 }
 0x58b   :  { %v1745_v20 = vpop.eup %1744 }
 0x58c   :  { %v566_v21 = vmul.f32 %v1745_v20, %v564_v19  ;;  %vm571_vm10 = vweird.f32 %v1745_v20 }
 0x58d   :  { %vm572_vm12 = vmor %vm570_vm11, %vm571_vm10  ;;  %vm615_vm10 = vcmp.gt.f32.partialorder %v2025_v27, 3.0 }
 0x58e   :  { %538 = vrot.lane.b32.xlu1 %v537_v10, %s1824_s2  ;;  %v567_v22 = vsub.f32 1.0, %v566_v21 }
 0x590   :  { %v568_v24 = vmul.f32 %v1745_v20, %v567_v22 }
 0x592   :  { %v569_v25 = vadd.f32 %v1745_v20, %v568_v24 }
 0x594   :  { %v573_v38 = vsel %vm572_vm12, %v1745_v20, %v569_v25 }
 0x595   :  { %v578_v43 = vsel %vm575_vm13, %v577_v54, %v573_v38 }
 0x596   :  { %v593_v5 = vsub.f32 1.0, %v578_v43 }
 0x5d4   :  { %v584_v41 = vpop.permute.xlu2 %583 }
 0x5d5   :  { %v586_v44 = vmul.f32 %v584_v41, %v578_v43 }
 0x5d7   :  { %588 = vrot.lane.b32.xlu2 %v586_v44, %s1820_s28 }
 0x5df   :  { %600 = vrot.lane.b32.xlu2 %v599_v45, %s1824_s2 }
 0x5f8   :  { %v527_v46 = vpop.permute.xlu1 %526 }
 0x5f9   :  { %v529_v47 = vadd.f32 %v527_v46, %v2010_v36 }
 0x5fb   :  { %1746 = vtanh.f32 %v529_v47 }
 0x600   :  { %v539_v55 = vpop.permute.xlu1 %538 }
 0x601   :  { %v1747_v48 = vpop.eup %1746  ;;  %v541_v60 = vmul.f32 %v539_v55, %v516_v3  ;;  %v549_v3 = vsub.f32 1.0, %v2141_v18 }
 0x602   :  { %533 = vrot.lane.b32.xlu0 %v1747_v48, %s1823_s21 }
 0x603   :  { %v550_v20 = vmul.f32 %v549_v3, %v2092_v17  ;;  %v2161_v17 = vsel %vm446_vm15, 1.0, %v1821_v15 }
 0x604   :  { %v611_v24 = vsub.f32 1.0, %v2161_v17 }
 0x631   :  { %v589_v50 = vpop.permute.xlu2 %588 }
 0x632   :  { %v591_v51 = vadd.f32 %v589_v50, %v2013_v40 }
 0x634   :  { %1748 = vtanh.f32 %v591_v51 }
 0x639   :  { %v601_v2 = vpop.permute.xlu2 %600 }
 0x63a   :  { %v1749_v52 = vpop.eup %1748  ;;  %v603_v10 = vmul.f32 %v601_v2, %v578_v43 }
 0x63b   :  { %595 = vrot.lane.b32.xlu1 %v1749_v52, %s1823_s21 }
 0x674   :  { %v534_v57 = vpop.permute.xlu0 %533 }
 0x675   :  { %v536_v61 = vmul.f32 %v534_v57, %v531_v56 }
 0x677   :  { %v542_v62 = vadd.f32 %v541_v60, %v536_v61 }
 0x679   :  { %v544_v63 = vrot.slane %v542_v62, 4 }
 0x67b   :  { %545 = vrot.lane.b32.xlu0 %v544_v63, %s1823_s21 }
 0x6ad   :  { %v596_v6 = vpop.permute.xlu1 %595 }
 0x6ae   :  { %v598_v11 = vmul.f32 %v596_v6, %v593_v5 }
 0x6b0   :  { %v604_v42 = vadd.f32 %v603_v10, %v598_v11 }
 0x6b2   :  { %v606_v13 = vrot.slane %v604_v42, 2 }
 0x6b4   :  { %607 = vrot.lane.b32.xlu0 %v606_v13, %s1823_s21 }
 0x6ed   :  { %v546_v19 = vpop.permute.xlu0 %545 }
 0x6ee   :  { %v2148_v21 = vmul.f32 %v2141_v18, %v546_v19 }
 0x6f0   :  { %v2151_v22 = vadd.f32 %v550_v20, %v2148_v21 }
 0x6f2   :  { %1677 = vmatmul.msk.f32.vlgmr.msra.gmra.mxu2 %vm49_vm0, %v2151_v22  ;;  %v709_v60 = vrot.slane %v2151_v22, 2 }
 0x6f3   :  { %1290 = vmatpush.msra.mxu2 %v1874_v0  ;;  %v612_v0 = vmul.f32 %v611_v24, %v2113_v37 }
 0x6f5   :  { %1291 = vmatpush.msra.mxu2 %v1879_v1 }
 0x6f7   :  { %1292 = vmatpush.msra.mxu2 %v1891_v4 }
 0x6f9   :  { %1293 = vmatpush.msra.mxu2 %v1915_v9 }
 0x726   :  { %v608_v25 = vpop.permute.xlu0 %607 }
 0x727   :  { %v610_v1 = vmul.f32 %v2161_v17, %v608_v25 }
 0x729   :  { %v2170_v4 = vadd.f32 %v612_v0, %v610_v1  ;;  %v2172_v9 = vadd.f32 %v610_v1, %v442_v32 }
 0x72b   :  { %1678 = vmatmul.msk.f32.vlgmr.msra.gmra.mxu3 %vm49_vm0, %v2170_v4 }
 0x72c   :  { %1313 = vmatpush.msra.mxu3 %v1905_v7 }
 0x72e   :  { %1314 = vmatpush.msra.mxu3 %v1910_v8 }
 0x730   :  { %1315 = vmatpush.msra.mxu3 %v1932_v14 }
 0x732   :  { %1316 = vmatpush.msra.mxu3 %v1940_v16 }
 0x775   :  { %v641_v53 = vpop.f32.mrf.mxu2 }
 0x776   :  { %v690_v35 = vadd.f32 %v641_v53, %v1997_v23  ;;  %v668_v54 = vrot.slane %v641_v53, 2 }
 0x778   :  { %v692_v37 = vrot.slane %v690_v35, 2  ;;  %v670_v7 = vadd.f32 %v668_v54, %v2010_v36 }
 0x77a   :  { %693 = vrot.lane.b32.xlu1 %v692_v37, %s1820_s28  ;;  %v1679_v41 = vmul.f32 -1.442695, %v670_v7 }
 0x77c   :  { %1750 = vpow2.f32 %v1679_v41 }
 0x782   :  { %v1751_v8 = vpop.eup %1750 }
 0x783   :  { %v674_v14 = vadd.f32 1.0, %v1751_v8 }
 0x785   :  { %1752 = vrcp.f32 %v674_v14  ;;  %v686_v47 = vand.u32 2147483648, %v674_v14  ;;  %vm680_vm2 = vweird.f32 %v674_v14  ;;  %v684_v48 = vand.u32 2147483647, %v674_v14 }
 0x787   :  { %v687_v51 = vor.u32 1.1754944e-38, %v686_v47  ;;  %vm685_vm4 = vcmp.eq.f32.partialorder %v684_v48, 8.507059e+37 }
 0x78b   :  { %v1753_v16 = vpop.eup %1752 }
 0x78c   :  { %v676_v43 = vmul.f32 %v1753_v16, %v674_v14  ;;  %vm681_vm1 = vweird.f32 %v1753_v16 }
 0x78d   :  { %vm682_vm3 = vmor %vm680_vm2, %vm681_vm1 }
 0x78e   :  { %v677_v44 = vsub.f32 1.0, %v676_v43 }
 0x790   :  { %v678_v45 = vmul.f32 %v1753_v16, %v677_v44 }
 0x792   :  { %v679_v46 = vadd.f32 %v1753_v16, %v678_v45 }
 0x794   :  { %v683_v50 = vsel %vm682_vm3, %v1753_v16, %v679_v46  ;;  %v2206_v46 = vsel %vm615_vm10, 1.0, %v1821_v15 }
 0x795   :  { %v688_v52 = vsel %vm685_vm4, %v687_v51, %v683_v50  ;;  %v721_v51 = vsub.f32 1.0, %v2206_v46 }
 0x796   :  { %v703_v7 = vsub.f32 1.0, %v688_v52 }
 0x7ae   :  { %v664_v33 = vpop.f32.mrf.mxu3 }
 0x7af   :  { %v749_v38 = vadd.f32 %v664_v33, %v2002_v28  ;;  %v729_v57 = vadd.f32 %v664_v33, %v2013_v40 }
 0x7b1   :  { %751 = vrot.lane.b32.xlu0 %v749_v38, %s1820_s28  ;;  %v1680_v61 = vmul.f32 -1.442695, %v729_v57 }
 0x7b3   :  { %1754 = vpow2.f32 %v1680_v61 }
 0x7b9   :  { %v1755_v62 = vpop.eup %1754 }
 0x7ba   :  { %v733_v63 = vadd.f32 1.0, %v1755_v62 }
 0x7bc   :  { %1756 = vrcp.f32 %v733_v63  ;;  %v745_v42 = vand.u32 2147483648, %v733_v63  ;;  %vm739_vm6 = vweird.f32 %v733_v63  ;;  %v743_v13 = vand.u32 2147483647, %v733_v63 }
 0x7be   :  { %v746_v20 = vor.u32 1.1754944e-38, %v745_v42  ;;  %vm744_vm8 = vcmp.eq.f32.partialorder %v743_v13, 8.507059e+37 }
 0x7c2   :  { %v1757_v2 = vpop.eup %1756 }
 0x7c3   :  { %v735_v5 = vmul.f32 %v1757_v2, %v733_v63  ;;  %vm740_vm5 = vweird.f32 %v1757_v2 }
 0x7c4   :  { %vm741_vm7 = vmor %vm739_vm6, %vm740_vm5 }
 0x7c5   :  { %v736_v6 = vsub.f32 1.0, %v735_v5 }
 0x7c7   :  { %v737_v10 = vmul.f32 %v1757_v2, %v736_v6 }
 0x7c9   :  { %v738_v11 = vadd.f32 %v1757_v2, %v737_v10 }
 0x7cb   :  { %v742_v19 = vsel %vm741_vm7, %v1757_v2, %v738_v11 }
 0x7cc   :  { %v747_v32 = vsel %vm744_vm8, %v746_v20, %v742_v19 }
 0x7cd   :  { %v761_v47 = vsub.f32 1.0, %v747_v32 }
 0x7ec   :  { %v694_v55 = vpop.permute.xlu1 %693 }
 0x7ed   :  { %v696_v56 = vmul.f32 %v694_v55, %v688_v52 }
 0x7ef   :  { %698 = vrot.lane.b32.xlu2 %v696_v56, %s1820_s28  ;;  %v722_v56 = vmul.f32 %v721_v51, %v2151_v22 }
 0x7f7   :  { %710 = vrot.lane.b32.xlu2 %v709_v60, %s1824_s2 }
 0x823   :  { %v752_v25 = vpop.permute.xlu0 %751 }
 0x824   :  { %v754_v0 = vmul.f32 %v752_v25, %v747_v32 }
 0x826   :  { %756 = vrot.lane.b32.xlu0 %v754_v0, %s1820_s28 }
 0x82e   :  { %767 = vrot.lane.b32.xlu0 %v2170_v4, %s1824_s2 }
 0x849   :  { %v699_v1 = vpop.permute.xlu2 %698 }
 0x84a   :  { %v701_v53 = vadd.f32 %v699_v1, %v2010_v36  ;;  %v2199_v36 = vsel %vm618_vm9, 1.0, %v1821_v15 }
 0x84c   :  { %1758 = vtanh.f32 %v701_v53 }
 0x851   :  { %v711_v54 = vpop.permute.xlu2 %710 }
 0x852   :  { %v1759_v35 = vpop.eup %1758  ;;  %v713_v8 = vmul.f32 %v711_v54, %v688_v52 }
 0x853   :  { %705 = vrot.lane.b32.xlu1 %v1759_v35, %s1823_s21 }
 0x898   :  { %v757_v37 = vpop.permute.xlu0 %756 }
 0x899   :  { %v759_v33 = vadd.f32 %v757_v37, %v2013_v40  ;;  %v773_v40 = vsub.f32 1.0, %v2199_v36 }
 0x89b   :  { %1760 = vtanh.f32 %v759_v33  ;;  %v774_v44 = vmul.f32 %v773_v40, %v2170_v4 }
 0x8a0   :  { %v768_v48 = vpop.permute.xlu0 %767 }
 0x8a1   :  { %v1761_v38 = vpop.eup %1760  ;;  %v770_v55 = vmul.f32 %v768_v48, %v747_v32 }
 0x8a2   :  { %763 = vrot.lane.b32.xlu2 %v1761_v38, %s1823_s21 }
 0x8c5   :  { %v706_v41 = vpop.permute.xlu1 %705 }
 0x8c6   :  { %v708_v14 = vmul.f32 %v706_v41, %v703_v7 }
 0x8c8   :  { %v714_v16 = vadd.f32 %v713_v8, %v708_v14 }
 0x8ca   :  { %v716_v43 = vrot.slane %v714_v16, 6 }
 0x8cc   :  { %717 = vrot.lane.b32.xlu1 %v716_v43, %s1823_s21 }
 0x8d4   :  { %776 = vrot.lane.b32.xlu1 %v774_v44, %s1824_s2 }
 0x8fc   :  { %v764_v45 = vpop.permute.xlu2 %763 }
 0x8fd   :  { %v766_v50 = vmul.f32 %v764_v45, %v761_v47 }
 0x8ff   :  { %v771_v57 = vadd.f32 %v770_v55, %v766_v50 }
 0x901   :  { %v2218_v15 = vmul.f32 %v2199_v36, %v771_v57 }
 0x93e   :  { %v718_v52 = vpop.permute.xlu1 %717 }
 0x93f   :  { %v2213_v4 = vmul.f32 %v2206_v46, %v718_v52 }
 0x941   :  { %v723_v60 = vadd.f32 %v722_v56, %v2213_v4 }
 0x943   :  { %1681 = vmatmul.msk.f32.vlgmr.msra.gmra.mxu0 %vm49_vm0, %v723_v60  ;;  %v877_v37 = vmul.f32 %v773_v40, %v723_v60 }
 0x946   :  { %v777_v61 = vpop.permute.xlu1 %776 }
 0x947   :  { %v2221_v62 = vadd.f32 %v777_v61, %v2218_v15 }
 0x949   :  { %809 = vrot.lane.b32.xlu2 %v2221_v62, %s1823_s21  ;;  %v926_v57 = vrot.slane %v2221_v62, 2 }
 0x9a3   :  { %v810_v63 = vpop.permute.xlu2 %809 }
 0x9a4   :  { %1682 = vmatmul.msk.f32.vlgmr.msrb.gmra.mxu1 %vm49_vm0, %v810_v63 }
 0x9c0   :  { %v805_v22 = vpop.f32.mrf.mxu0 }
 0x9c1   :  { %v853_v2 = vadd.f32 %v805_v22, %v1997_v23  ;;  %v833_v5 = vadd.f32 %v805_v22, %v1999_v26 }
 0x9c3   :  { %855 = vrot.lane.b32.xlu0 %v853_v2, %s1820_s28  ;;  %v1683_v6 = vmul.f32 -1.442695, %v833_v5 }
 0x9c5   :  { %1762 = vpow2.f32 %v1683_v6 }
 0x9cb   :  { %v1763_v10 = vpop.eup %1762 }
 0x9cc   :  { %v837_v11 = vadd.f32 1.0, %v1763_v10 }
 0x9ce   :  { %1764 = vrcp.f32 %v837_v11  ;;  %v849_v7 = vand.u32 2147483648, %v837_v11  ;;  %vm843_vm12 = vweird.f32 %v837_v11  ;;  %v847_v41 = vand.u32 2147483647, %v837_v11 }
 0x9d0   :  { %v850_v14 = vor.u32 1.1754944e-38, %v849_v7  ;;  %vm848_vm14 = vcmp.eq.f32.partialorder %v847_v41, 8.507059e+37 }
 0x9d4   :  { %v1765_v42 = vpop.eup %1764 }
 0x9d5   :  { %v839_v25 = vmul.f32 %v1765_v42, %v837_v11  ;;  %vm844_vm11 = vweird.f32 %v1765_v42 }
 0x9d6   :  { %vm845_vm13 = vmor %vm843_vm12, %vm844_vm11 }
 0x9d7   :  { %v840_v53 = vsub.f32 1.0, %v839_v25 }
 0x9d9   :  { %v841_v35 = vmul.f32 %v1765_v42, %v840_v53 }
 0x9db   :  { %v842_v38 = vadd.f32 %v1765_v42, %v841_v35 }
 0x9dd   :  { %v846_v8 = vsel %vm845_vm13, %v1765_v42, %v842_v38 }
 0x9de   :  { %v851_v43 = vsel %vm848_vm14, %v850_v14, %v846_v8 }
 0xa21   :  { %v830_v13 = vpop.f32.mrf.mxu1 }
 0xa22   :  { %v885_v19 = vrot.slane %v830_v13, 2  ;;  %v907_v20 = vadd.f32 %v830_v13, %v2002_v28  ;;  %v865_v13 = vsub.f32 1.0, %v851_v43 }
 0xa24   :  { %v887_v32 = vadd.f32 %v885_v19, %v2007_v34  ;;  %v909_v0 = vrot.slane %v907_v20, 2 }
 0xa26   :  { %v1684_v1 = vmul.f32 -1.442695, %v887_v32  ;;  %910 = vrot.lane.b32.xlu2 %v909_v0, %s1820_s28 }
 0xa28   :  { %1766 = vpow2.f32 %v1684_v1 }
 0xa2e   :  { %v1767_v33 = vpop.eup %1766  ;;  %879 = vrot.lane.b32.xlu2 %v877_v37, %s1824_s2  ;;  %v936_v37 = vmul.f32 %v2221_v62, %v721_v51 }
 0xa2f   :  { %v891_v54 = vadd.f32 1.0, %v1767_v33 }
 0xa31   :  { %1768 = vrcp.f32 %v891_v54  ;;  %v903_v48 = vand.u32 2147483648, %v891_v54  ;;  %v901_v52 = vand.u32 2147483647, %v891_v54  ;;  %vm897_vm1 = vweird.f32 %v891_v54 }
 0xa33   :  { %v904_v56 = vor.u32 1.1754944e-38, %v903_v48  ;;  %vm902_vm3 = vcmp.eq.f32.partialorder %v901_v52, 8.507059e+37 }
 0xa35   :  { %v856_v16 = vpop.permute.xlu0 %855 }
 0xa36   :  { %v858_v44 = vmul.f32 %v856_v16, %v851_v43 }
 0xa37   :  { %v1769_v45 = vpop.eup %1768 }
 0xa38   :  { %860 = vrot.lane.b32.xlu1 %v858_v44, %s1820_s28  ;;  %v893_v40 = vmul.f32 %v1769_v45, %v891_v54  ;;  %vm898_vm15 = vweird.f32 %v1769_v45 }
 0xa39   :  { %vm899_vm2 = vmor %vm897_vm1, %vm898_vm15 }
 0xa3a   :  { %v894_v47 = vsub.f32 1.0, %v893_v40 }
 0xa3c   :  { %v895_v50 = vmul.f32 %v1769_v45, %v894_v47 }
 0xa3e   :  { %v896_v55 = vadd.f32 %v1769_v45, %v895_v50 }
 0xa40   :  { %871 = vrot.lane.b32.xlu1 %v723_v60, %s1824_s2  ;;  %v900_v61 = vsel %vm899_vm2, %v1769_v45, %v896_v55 }
 0xa41   :  { %v905_v63 = vsel %vm902_vm3, %v904_v56, %v900_v61 }
 0xa42   :  { %v928_v22 = vmul.f32 %v926_v57, %v905_v63 }
 0xa80   :  { %v911_v10 = vpop.permute.xlu2 %910 }
 0xa81   :  { %v913_v11 = vmul.f32 %v911_v10, %v905_v63 }
 0xa88   :  { %v880_v0 = vpop.permute.xlu2 %879 }
 0xaaa   :  { %v861_v2 = vpop.permute.xlu1 %860 }
 0xaab   :  { %v863_v5 = vadd.f32 %v861_v2, %v1999_v26 }
 0xaad   :  { %1770 = vtanh.f32 %v863_v5 }
 0xab2   :  { %v872_v42 = vpop.permute.xlu1 %871 }
 0xab3   :  { %v1771_v6 = vpop.eup %1770  ;;  %v874_v20 = vmul.f32 %v872_v42, %v851_v43 }
 0xab4   :  { %867 = vrot.lane.b32.xlu0 %v1771_v6, %s1823_s21 }
 0xabc   :  { %915 = vrot.lane.b32.xlu0 %v913_v11, %s1820_s28 }
 0xb26   :  { %v868_v19 = vpop.permute.xlu0 %867 }
 0xb27   :  { %v870_v60 = vmul.f32 %v868_v19, %v865_v13 }
 0xb29   :  { %v875_v25 = vadd.f32 %v874_v20, %v870_v60 }
 0xb2b   :  { %v2240_v32 = vmul.f32 %v2199_v36, %v875_v25  ;;  %v920_v36 = vsub.f32 1.0, %v905_v63 }
 0xb2d   :  { %v2243_v1 = vadd.f32 %v880_v0, %v2240_v32 }
 0xb2e   :  { %v916_v53 = vpop.permute.xlu0 %915 }
 0xb2f   :  { %v918_v35 = vadd.f32 %v916_v53, %v2007_v34  ;;  %944 = vrot.lane.b32.xlu1 %v2243_v1, %s1823_s21  ;;  %v1033_v6 = vrot.slane %v2243_v1, 6 }
 0xb31   :  { %1772 = vtanh.f32 %v918_v35 }
 0xb37   :  { %v1773_v33 = vpop.eup %1772  ;;  %938 = vrot.lane.b32.xlu1 %v936_v37, %s1823_s21 }
 0xb38   :  { %922 = vrot.lane.b32.xlu2 %v1773_v33, %s1823_s21 }
 0xb92   :  { %v923_v38 = vpop.permute.xlu2 %922 }
 0xb93   :  { %v925_v54 = vmul.f32 %v923_v38, %v920_v36 }
 0xb95   :  { %v929_v7 = vadd.f32 %v928_v22, %v925_v54 }
 0xb97   :  { %v931_v41 = vrot.slane %v929_v7, 6 }
 0xb99   :  { %932 = vrot.lane.b32.xlu0 %v931_v41, %s1823_s21 }
 0xba1   :  { %v945_v8 = vpop.permute.xlu1 %944 }
 0xba2   :  { %1685 = vmatmul.msk.f32.vlgmr.msrb.gmra.mxu2 %vm49_vm0, %v945_v8 }
 0xba9   :  { %v939_v51 = vpop.permute.xlu1 %938 }
 0xc0b   :  { %v933_v14 = vpop.permute.xlu0 %932 }
 0xc0c   :  { %v2256_v16 = vmul.f32 %v2206_v46, %v933_v14 }
 0xc0e   :  { %v2259_v62 = vadd.f32 %v939_v51, %v2256_v16 }
 0xc10   :  { %1686 = vmatmul.msk.f32.vlgmr.msrb.gmra.mxu3 %vm49_vm0, %v2259_v62 }
 0xc25   :  { %v965_v43 = vpop.f32.mrf.mxu2 }
 0xc26   :  { %v992_v44 = vrot.slane %v965_v43, 6  ;;  %v1014_v45 = vadd.f32 %v965_v43, %v1997_v23 }
 0xc28   :  { %v994_v40 = vadd.f32 %v992_v44, %v1999_v26  ;;  %v1016_v47 = vrot.slane %v1014_v45, 6 }
 0xc2a   :  { %v1687_v48 = vmul.f32 -1.442695, %v994_v40  ;;  %1017 = vrot.lane.b32.xlu2 %v1016_v47, %s1820_s28  ;;  %v1043_v40 = vmul.f32 %v2243_v1, %v611_v24 }
 0xc2c   :  { %1774 = vpow2.f32 %v1687_v48 }
 0xc32   :  { %v1775_v46 = vpop.eup %1774 }
 0xc33   :  { %v998_v50 = vadd.f32 1.0, %v1775_v46 }
 0xc35   :  { %1776 = vrcp.f32 %v998_v50  ;;  %v1010_v57 = vand.u32 2147483648, %v998_v50  ;;  %v1008_v63 = vand.u32 2147483647, %v998_v50  ;;  %vm1004_vm5 = vweird.f32 %v998_v50 }
 0xc37   :  { %v1011_v2 = vor.u32 1.1754944e-38, %v1010_v57  ;;  %vm1009_vm7 = vcmp.eq.f32.partialorder %v1008_v63, 8.507059e+37 }
 0xc3b   :  { %v1777_v52 = vpop.eup %1776 }
 0xc3c   :  { %v1000_v55 = vmul.f32 %v1777_v52, %v998_v50  ;;  %vm1005_vm4 = vweird.f32 %v1777_v52 }
 0xc3d   :  { %vm1006_vm6 = vmor %vm1004_vm5, %vm1005_vm4 }
 0xc3e   :  { %v1001_v56 = vsub.f32 1.0, %v1000_v55 }
 0xc40   :  { %v1002_v61 = vmul.f32 %v1777_v52, %v1001_v56 }
 0xc42   :  { %v1003_v22 = vadd.f32 %v1777_v52, %v1002_v61  ;;  %v1096_v61 = vrot.slane %v2259_v62, 4 }
 0xc44   :  { %v1007_v5 = vsel %vm1006_vm6, %v1777_v52, %v1003_v22 }
 0xc45   :  { %v1012_v10 = vsel %vm1009_vm7, %v1011_v2, %v1007_v5 }
 0xc46   :  { %v1035_v11 = vmul.f32 %v1033_v6, %v1012_v10  ;;  %v1027_v50 = vsub.f32 1.0, %v1012_v10 }
 0xc84   :  { %v1018_v42 = vpop.permute.xlu2 %1017 }
 0xc85   :  { %v1020_v13 = vmul.f32 %v1018_v42, %v1012_v10 }
 0xc87   :  { %1022 = vrot.lane.b32.xlu0 %v1020_v13, %s1820_s28 }
 0xc93   :  { %v988_v19 = vpop.f32.mrf.mxu3 }
 0xc94   :  { %v1077_v20 = vadd.f32 %v988_v19, %v2002_v28  ;;  %v1055_v25 = vrot.slane %v988_v19, 4 }
 0xc96   :  { %v1079_v60 = vrot.slane %v1077_v20, 4  ;;  %v1057_v0 = vadd.f32 %v1055_v25, %v2007_v34 }
 0xc98   :  { %1080 = vrot.lane.b32.xlu1 %v1079_v60, %s1820_s28  ;;  %v1688_v53 = vmul.f32 -1.442695, %v1057_v0 }
 0xc9a   :  { %1778 = vpow2.f32 %v1688_v53 }
 0xca0   :  { %v1779_v35 = vpop.eup %1778 }
 0xca1   :  { %v1061_v37 = vadd.f32 1.0, %v1779_v35  ;;  %v1108_v35 = vmul.f32 %v2259_v62, %v549_v3 }
 0xca3   :  { %1780 = vrcp.f32 %v1061_v37  ;;  %v1073_v51 = vand.u32 2147483648, %v1061_v37  ;;  %vm1067_vm9 = vweird.f32 %v1061_v37  ;;  %v1071_v43 = vand.u32 2147483647, %v1061_v37 }
 0xca5   :  { %v1074_v45 = vor.u32 1.1754944e-38, %v1073_v51  ;;  %vm1072_vm11 = vcmp.eq.f32.partialorder %v1071_v43, 8.507059e+37 }
 0xca9   :  { %v1781_v33 = vpop.eup %1780 }
 0xcaa   :  { %v1063_v36 = vmul.f32 %v1781_v33, %v1061_v37  ;;  %vm1068_vm8 = vweird.f32 %v1781_v33 }
 0xcab   :  { %vm1069_vm10 = vmor %vm1067_vm9, %vm1068_vm8 }
 0xcac   :  { %v1064_v7 = vsub.f32 1.0, %v1063_v36 }
 0xcae   :  { %v1065_v41 = vmul.f32 %v1781_v33, %v1064_v7 }
 0xcb0   :  { %v1066_v14 = vadd.f32 %v1781_v33, %v1065_v41 }
 0xcb2   :  { %v1070_v44 = vsel %vm1069_vm10, %v1781_v33, %v1066_v14 }
 0xcb3   :  { %v1075_v48 = vsel %vm1072_vm11, %v1074_v45, %v1070_v44 }
 0xcf9   :  { %v1023_v38 = vpop.permute.xlu0 %1022 }
 0xcfa   :  { %v1025_v54 = vadd.f32 %v1023_v38, %v1999_v26 }
 0xcfc   :  { %1782 = vtanh.f32 %v1025_v54 }
 0xd02   :  { %v1783_v8 = vpop.eup %1782 }
 0xd03   :  { %1029 = vrot.lane.b32.xlu2 %v1783_v8, %s1823_s21 }
 0xd0a   :  { %v1081_v47 = vpop.permute.xlu1 %1080 }
 0xd0b   :  { %v1083_v46 = vmul.f32 %v1081_v47, %v1075_v48  ;;  %1045 = vrot.lane.b32.xlu2 %v1043_v40, %s1823_s21 }
 0xd0d   :  { %1085 = vrot.lane.b32.xlu0 %v1083_v46, %s1820_s28 }
 0xd5d   :  { %v1030_v52 = vpop.permute.xlu2 %1029 }
 0xd5e   :  { %v1032_v55 = vmul.f32 %v1030_v52, %v1027_v50 }
 0xd60   :  { %v1036_v56 = vadd.f32 %v1035_v11, %v1032_v55  ;;  %v1090_v11 = vsub.f32 1.0, %v1075_v48 }
 0xd62   :  { %v1038_v57 = vrot.slane %v1036_v56, 2 }
 0xd64   :  { %1039 = vrot.lane.b32.xlu1 %v1038_v57, %s1823_s21 }
 0xd65   :  { %v1046_v5 = vpop.permute.xlu2 %1045 }
 0xd6c   :  { %1097 = vrot.lane.b32.xlu1 %v1096_v61, %s1824_s2 }
 0xd7f   :  { %v1086_v63 = vpop.permute.xlu0 %1085 }
 0xd80   :  { %v1088_v24 = vadd.f32 %v1086_v63, %v2007_v34 }
 0xd82   :  { %1784 = vtanh.f32 %v1088_v24 }
 0xd88   :  { %v1785_v1 = vpop.eup %1784 }
 0xd89   :  { %1092 = vrot.lane.b32.xlu0 %v1785_v1, %s1823_s21 }
 0xdd6   :  { %v1040_v22 = vpop.permute.xlu1 %1039 }
 0xdd7   :  { %v2284_v2 = vmul.f32 %v2161_v17, %v1040_v22 }
 0xdd9   :  { %v2287_v6 = vadd.f32 %v1046_v5, %v2284_v2 }
 0xddb   :  { %1689 = vmatmul.msk.f32.vlgmr.msrb.gmra.mxu0 %vm49_vm0, %v2287_v6  ;;  %v1199_v46 = vrot.slane %v2287_v6, 4 }
 0xdde   :  { %v1098_v10 = vpop.permute.xlu1 %1097 }
 0xddf   :  { %v1100_v13 = vmul.f32 %v1098_v10, %v1075_v48 }
 0xdfb   :  { %v1093_v42 = vpop.permute.xlu0 %1092 }
 0xdfc   :  { %v1095_v19 = vmul.f32 %v1093_v42, %v1090_v11 }
 0xdfe   :  { %v1101_v20 = vadd.f32 %v1100_v13, %v1095_v19 }
 0xe00   :  { %v1103_v60 = vrot.slane %v1101_v20, 4 }
 0xe02   :  { %1104 = vrot.lane.b32.xlu2 %v1103_v60, %s1823_s21 }
 0xe58   :  { %v1131_v25 = vpop.f32.mrf.mxu0 }
 0xe59   :  { %v1180_v17 = vadd.f32 %v1131_v25, %v1997_v23  ;;  %v1158_v36 = vrot.slane %v1131_v25, 4 }
 0xe5b   :  { %v1182_v0 = vrot.slane %v1180_v17, 4  ;;  %v1160_v38 = vadd.f32 %v1158_v36, %v1999_v26 }
 0xe5c   :  { %v1105_v53 = vpop.permute.xlu2 %1104 }
 0xe5d   :  { %v2297_v37 = vmul.f32 %v2141_v18, %v1105_v53  ;;  %1183 = vrot.lane.b32.xlu0 %v1182_v0, %s1820_s28  ;;  %v1691_v54 = vmul.f32 -1.442695, %v1160_v38 }
 0xe5f   :  { %v2301_v33 = vadd.f32 %v1108_v35, %v2297_v37  ;;  %1786 = vpow2.f32 %v1691_v54 }
 0xe61   :  { %1690 = vmatmul.msk.f32.vlgmr.msra.gmra.mxu1 %vm49_vm0, %v2301_v33  ;;  %v1260_v35 = vrot.slane %v2301_v33, 6 }
 0xe65   :  { %v1787_v7 = vpop.eup %1786 }
 0xe66   :  { %v1164_v41 = vadd.f32 1.0, %v1787_v7 }
 0xe68   :  { %1788 = vrcp.f32 %v1164_v41  ;;  %v1176_v51 = vand.u32 2147483648, %v1164_v41  ;;  %vm1170_vm13 = vweird.f32 %v1164_v41  ;;  %v1174_v43 = vand.u32 2147483647, %v1164_v41 }
 0xe6a   :  { %v1177_v45 = vor.u32 1.1754944e-38, %v1176_v51  ;;  %vm1175_vm15 = vcmp.eq.f32.partialorder %v1174_v43, 8.507059e+37 }
 0xe6e   :  { %v1789_v3 = vpop.eup %1788 }
 0xe6f   :  { %v1166_v62 = vmul.f32 %v1789_v3, %v1164_v41  ;;  %vm1171_vm12 = vweird.f32 %v1789_v3 }
 0xe70   :  { %vm1172_vm14 = vmor %vm1170_vm13, %vm1171_vm12  ;;  %vm1520_vm13 = vcmask 254976  }
 0xe71   :  { %v1167_v18 = vsub.f32 1.0, %v1166_v62 }
 0xe73   :  { %v1168_v8 = vmul.f32 %v1789_v3, %v1167_v18 }
 0xe75   :  { %v1169_v14 = vadd.f32 %v1789_v3, %v1168_v8 }
 0xe77   :  { %v1173_v44 = vsel %vm1172_vm14, %v1789_v3, %v1169_v14 }
 0xe78   :  { %v1178_v40 = vsel %vm1175_vm15, %v1177_v45, %v1173_v44 }
 0xe79   :  { %v1193_v3 = vsub.f32 1.0, %v1178_v40 }
 0xecf   :  { %v1184_v47 = vpop.permute.xlu0 %1183 }
 0xed0   :  { %v1186_v48 = vmul.f32 %v1184_v47, %v1178_v40 }
 0xed2   :  { %1188 = vrot.lane.b32.xlu1 %v1186_v48, %s1820_s28 }
 0xeda   :  { %1200 = vrot.lane.b32.xlu1 %v1199_v46, %s1824_s2 }
 0xede   :  { %v1154_v50 = vpop.f32.mrf.mxu1 }
 0xedf   :  { %v1241_v52 = vadd.f32 %v1154_v50, %v2002_v28  ;;  %v1219_v56 = vrot.slane %v1154_v50, 6 }
 0xee1   :  { %v1243_v55 = vrot.slane %v1241_v52, 6  ;;  %v1221_v57 = vadd.f32 %v1219_v56, %v2007_v34 }
 0xee3   :  { %1244 = vrot.lane.b32.xlu2 %v1243_v55, %s1820_s28  ;;  %v1692_v61 = vmul.f32 -1.442695, %v1221_v57  ;;  %v1211_v55 = vmul.f32 %v2287_v6, %v439_v31 }
 0xee5   :  { %1790 = vpow2.f32 %v1692_v61  ;;  %v1272_v61 = vmul.f32 %v2301_v33, %v373_v59 }
 0xeeb   :  { %v1791_v63 = vpop.eup %1790 }
 0xeec   :  { %v1225_v24 = vadd.f32 1.0, %v1791_v63 }
 0xeee   :  { %1792 = vrcp.f32 %v1225_v24  ;;  %v1237_v42 = vand.u32 2147483648, %v1225_v24  ;;  %vm1231_vm2 = vweird.f32 %v1225_v24  ;;  %v1235_v13 = vand.u32 2147483647, %v1225_v24 }
 0xef0   :  { %v1238_v20 = vor.u32 1.1754944e-38, %v1237_v42  ;;  %vm1236_vm4 = vcmp.eq.f32.partialorder %v1235_v13, 8.507059e+37 }
 0xef4   :  { %v1793_v1 = vpop.eup %1792 }
 0xef5   :  { %v1227_v22 = vmul.f32 %v1793_v1, %v1225_v24  ;;  %vm1232_vm1 = vweird.f32 %v1793_v1 }
 0xef6   :  { %vm1233_vm3 = vmor %vm1231_vm2, %vm1232_vm1 }
 0xef7   :  { %v1228_v5 = vsub.f32 1.0, %v1227_v22 }
 0xef9   :  { %v1229_v10 = vmul.f32 %v1793_v1, %v1228_v5 }
 0xefb   :  { %v1230_v11 = vadd.f32 %v1793_v1, %v1229_v10 }
 0xefd   :  { %v1234_v19 = vsel %vm1233_vm3, %v1793_v1, %v1230_v11  ;;  %vm1594_vm3 = vcmask 523264  }
 0xefe   :  { %v1239_v25 = vsel %vm1236_vm4, %v1238_v20, %v1234_v19 }
 0xeff   :  { %v1254_v44 = vsub.f32 1.0, %v1239_v25 }
 0xf3d   :  { %v1245_v60 = vpop.permute.xlu2 %1244 }
 0xf3e   :  { %v1247_v17 = vmul.f32 %v1245_v60, %v1239_v25 }
 0xf40   :  { %1249 = vrot.lane.b32.xlu2 %v1247_v17, %s1820_s28 }
 0xf44   :  { %v1189_v0 = vpop.permute.xlu1 %1188 }
 0xf45   :  { %v1191_v53 = vadd.f32 %v1189_v0, %v1999_v26 }
 0xf47   :  { %1794 = vtanh.f32 %v1191_v53 }
 0xf48   :  { %1261 = vrot.lane.b32.xlu2 %v1260_v35, %s1824_s2 }
 0xf4c   :  { %v1201_v41 = vpop.permute.xlu1 %1200 }
 0xf4d   :  { %v1795_v36 = vpop.eup %1794  ;;  %v1203_v18 = vmul.f32 %v1201_v41, %v1178_v40 }
 0xf4e   :  { %1195 = vrot.lane.b32.xlu0 %v1795_v36, %s1823_s21 }
 0xf9a   :  { %v1250_v38 = vpop.permute.xlu2 %1249 }
 0xf9b   :  { %v1252_v54 = vadd.f32 %v1250_v38, %v2007_v34 }
 0xf9d   :  { %1796 = vtanh.f32 %v1252_v54 }
 0xfa2   :  { %v1262_v43 = vpop.permute.xlu2 %1261 }
 0xfa3   :  { %v1797_v7 = vpop.eup %1796  ;;  %v1264_v47 = vmul.f32 %v1262_v43, %v1239_v25 }
 0xfa4   :  { %1256 = vrot.lane.b32.xlu1 %v1797_v7, %s1823_s21 }
 0xfc0   :  { %v1196_v62 = vpop.permute.xlu0 %1195 }
 0xfc1   :  { %v1198_v8 = vmul.f32 %v1196_v62, %v1193_v3 }
 0xfc3   :  { %v1204_v14 = vadd.f32 %v1203_v18, %v1198_v8 }
 0xfc5   :  { %v1206_v51 = vrot.slane %v1204_v14, 4 }
 0xfc7   :  { %1207 = vrot.lane.b32.xlu0 %v1206_v51, %s1823_s21 }
0x1016   :  { %v1257_v45 = vpop.permute.xlu1 %1256 }
0x1017   :  { %v1259_v48 = vmul.f32 %v1257_v45, %v1254_v44 }
0x1019   :  { %v1265_v46 = vadd.f32 %v1264_v47, %v1259_v48 }
0x101b   :  { %v1267_v50 = vrot.slane %v1265_v46, 2 }
0x101d   :  { %1268 = vrot.lane.b32.xlu0 %v1267_v50, %s1823_s21 }
0x1039   :  { %v1208_v52 = vpop.permute.xlu0 %1207 }
0x103a   :  { %v2325_v40 = vmul.f32 %v2103_v30, %v1208_v52 }
0x103c   :  { %v1212_v56 = vadd.f32 %v1211_v55, %v2325_v40 }
0x103e   :  { %1693 = vmatmul.msk.f32.vlgmr.msra.gmra.mxu2 %vm49_vm0, %v1212_v56 }
0x108f   :  { %v1269_v57 = vpop.permute.xlu0 %1268 }
0x1090   :  { %v2333_v63 = vmul.f32 %v2076_v58, %v1269_v57 }
0x1092   :  { %v2336_v24 = vadd.f32 %v1272_v61, %v2333_v63 }
0x1094   :  { %1694 = vmatmul.msk.f32.vlgmr.msra.gmra.mxu3 %vm49_vm0, %v2336_v24 }
0x10c1   :  { %v1295_v30 = vpop.f32.mrf.mxu2 }
0x10c2   :  { %v1344_v31 = vadd.f32 %v1295_v30, %v1997_v23  ;;  %v1322_v1 = vrot.slane %v1295_v30, 2 }
0x10c4   :  { %v1346_v6 = vrot.slane %v1344_v31, 2  ;;  %v1324_v22 = vadd.f32 %v1322_v1, %v1999_v26 }
0x10c6   :  { %1347 = vrot.lane.b32.xlu1 %v1346_v6, %s1820_s28  ;;  %v1695_v5 = vmul.f32 -1.442695, %v1324_v22 }
0x10c8   :  { %1798 = vpow2.f32 %v1695_v5 }
0x10ce   :  { %v1799_v59 = vpop.eup %1798 }
0x10cf   :  { %v1328_v33 = vadd.f32 1.0, %v1799_v59 }
0x10d1   :  { %1800 = vrcp.f32 %v1328_v33  ;;  %v1340_v20 = vand.u32 2147483648, %v1328_v33  ;;  %vm1334_vm6 = vweird.f32 %v1328_v33  ;;  %v1338_v60 = vand.u32 2147483647, %v1328_v33 }
0x10d3   :  { %v1341_v17 = vor.u32 1.1754944e-38, %v1340_v20  ;;  %vm1339_vm8 = vcmp.eq.f32.partialorder %v1338_v60, 8.507059e+37  ;;  %v1437_v60 = vld [vmem:[%s2480_s5 + $0x28] sm:$0xff] }
0x10d7   :  { %v1801_v11 = vpop.eup %1800 }
0x10d8   :  { %v1330_v42 = vmul.f32 %v1801_v11, %v1328_v33  ;;  %vm1335_vm5 = vweird.f32 %v1801_v11 }
0x10d9   :  { %vm1336_vm7 = vmor %vm1334_vm6, %vm1335_vm5  ;;  %vm1622_vm6 = vcmask 1041408  }
0x10da   :  { %v1331_v13 = vsub.f32 1.0, %v1330_v42 }
0x10dc   :  { %v1332_v23 = vmul.f32 %v1801_v11, %v1331_v13 }
0x10de   :  { %v1333_v19 = vadd.f32 %v1801_v11, %v1332_v23 }
0x10e0   :  { %v1337_v25 = vsel %vm1336_vm7, %v1801_v11, %v1333_v19 }
0x10e1   :  { %v1342_v0 = vsel %vm1339_vm8, %v1341_v17, %v1337_v25 }
0x10e2   :  { %v1357_v61 = vsub.f32 1.0, %v1342_v0 }
0x1117   :  { %v1318_v58 = vpop.f32.mrf.mxu3 }
0x1118   :  { %v1400_v10 = vadd.f32 %v1318_v58, %v2002_v28  ;;  %v1363_v28 = vrot.slane %v1212_v56, 2  ;;  %v1380_v36 = vadd.f32 %v1318_v58, %v2007_v34 }
0x111a   :  { %1402 = vrot.lane.b32.xlu0 %v1400_v10, %s1820_s28  ;;  %v1696_v38 = vmul.f32 -1.442695, %v1380_v36 }
0x111c   :  { %1802 = vpow2.f32 %v1696_v38 }
0x1122   :  { %v1803_v54 = vpop.eup %1802 }
0x1123   :  { %v1384_v7 = vadd.f32 1.0, %v1803_v54 }
0x1125   :  { %1804 = vrcp.f32 %v1384_v7  ;;  %v1396_v14 = vand.u32 2147483648, %v1384_v7  ;;  %vm1390_vm10 = vweird.f32 %v1384_v7  ;;  %v1394_v51 = vand.u32 2147483647, %v1384_v7 }
0x1127   :  { %v1397_v44 = vor.u32 1.1754944e-38, %v1396_v14  ;;  %vm1395_vm12 = vcmp.eq.f32.partialorder %v1394_v51, 8.507059e+37  ;;  %v1493_v14 = vld [vmem:[%s2481_s1] sm:$0x3] }
0x112b   :  { %v1805_v41 = vpop.eup %1804 }
0x112c   :  { %v1386_v3 = vmul.f32 %v1805_v41, %v1384_v7  ;;  %vm1391_vm9 = vweird.f32 %v1805_v41 }
0x112d   :  { %vm1392_vm11 = vmor %vm1390_vm10, %vm1391_vm9 }
0x112e   :  { %v1387_v62 = vsub.f32 1.0, %v1386_v3 }
0x1130   :  { %v1388_v18 = vmul.f32 %v1805_v41, %v1387_v62  ;;  %v1433_v62 = vld [vmem:[%s2480_s5 + $0x8] sm:$0xff] }
0x1132   :  { %v1389_v8 = vadd.f32 %v1805_v41, %v1388_v18  ;;  %v1440_v18 = vld [vmem:[%s2480_s5 + $0x40] sm:$0xff] }
0x1134   :  { %v1393_v43 = vsel %vm1392_vm11, %v1805_v41, %v1389_v8  ;;  %v1432_v8 = vld [vmem:[%s2480_s5] sm:$0xff] }
0x1135   :  { %v1398_v45 = vsel %vm1395_vm12, %v1397_v44, %v1393_v43  ;;  %v2425_v43 = vld [vmem:[%s2482_s7] sm:$0x1f] }
0x1136   :  { %v1412_v22 = vsub.f32 1.0, %v1398_v45 }
0x1138   :  { %v1348_v53 = vpop.permute.xlu1 %1347 }
0x1139   :  { %v1350_v35 = vmul.f32 %v1348_v53, %v1342_v0 }
0x113b   :  { %1352 = vrot.lane.b32.xlu2 %v1350_v35, %s1820_s28 }
0x1143   :  { %1364 = vrot.lane.b32.xlu2 %v1363_v28, %s1824_s2 }
0x114b   :  { %381 = vrot.lane.b32.xlu2 %v2089_v12, %s1824_s2 }
0x118c   :  { %v1403_v12 = vpop.permute.xlu0 %1402 }
0x118d   :  { %v1405_v47 = vmul.f32 %v1403_v12, %v1398_v45 }
0x118f   :  { %1407 = vrot.lane.b32.xlu0 %v1405_v47, %s1820_s28 }
0x1195   :  { %v1353_v48 = vpop.permute.xlu2 %1352 }
0x1196   :  { %v1355_v46 = vadd.f32 %v1353_v48, %v1999_v26  ;;  %v1518_v48 = vperm.slane %v2425_v43, 0 }
0x1197   :  { %553 = vrot.lane.b32.xlu0 %v2148_v21, %s1824_s2 }
0x1198   :  { %1806 = vtanh.f32 %v1355_v46 }
0x119d   :  { %v1365_v57 = vpop.permute.xlu2 %1364 }
0x119e   :  { %v1807_v50 = vpop.eup %1806  ;;  %v1367_v30 = vmul.f32 %v1365_v57, %v1342_v0 }
0x119f   :  { %1418 = vrot.lane.b32.xlu0 %v2336_v24, %s1824_s2  ;;  %1359 = vrot.lane.b32.xlu1 %v1807_v50, %s1823_s21 }
0x11a5   :  { %v382_v24 = vpop.permute.xlu2 %381 }
0x11a6   :  { %v384_v11 = vadd.f32 %v382_v24, %v2033_v39 }
0x1201   :  { %v1408_v52 = vpop.permute.xlu0 %1407 }
0x1202   :  { %v1410_v55 = vadd.f32 %v1408_v52, %v2007_v34 }
0x1204   :  { %1808 = vtanh.f32 %v1410_v55  ;;  %v1825_v55 = vmov 32.0  }
0x1205   :  { %1810 = vrcp.f32 %v2025_v27  ;;  %v1442_v27 = vld [vmem:[%s2480_s5 + $0x50] sm:$0xff] }
0x1206   :  { %1812 = vrcp.f32 %v1825_v55 }
0x1209   :  { %v554_v34 = vpop.permute.xlu0 %553 }
0x120a   :  { %v1809_v56 = vpop.eup %1808 }
0x120b   :  { %1414 = vrot.lane.b32.xlu2 %v1809_v56, %s1823_s21  ;;  %v1811_v36 = vpop.eup %1810 }
0x120c   :  { %v1813_v56 = vpop.eup %1812 }
0x120d   :  { %v1525_v57 = vmul.f32 32.0, %v1813_v56  ;;  %vm1529_vm14 = vweird.f32 %v1813_v56 }
0x1211   :  { %v1360_v26 = vpop.permute.xlu1 %1359  ;;  %v1419_v1 = vpop.permute.xlu0 %1418 }
0x1212   :  { %v1362_v31 = vmul.f32 %v1360_v26, %v1357_v61  ;;  %v1421_v59 = vmul.f32 %v1419_v1, %v1398_v45  ;;  %v1526_v61 = vsub.f32 1.0, %v1525_v57 }
0x1213   :  { %1214 = vrot.lane.b32.xlu2 %v2325_v40, %s1824_s2 }
0x1214   :  { %v1368_v21 = vadd.f32 %v1367_v30, %v1362_v31  ;;  %v1527_v26 = vmul.f32 %v1813_v56, %v1526_v61 }
0x1216   :  { %v1370_v6 = vrot.slane %v1368_v21, 6  ;;  %v1528_v30 = vadd.f32 %v1813_v56, %v1527_v26 }
0x1218   :  { %1371 = vrot.lane.b32.xlu1 %v1370_v6, %s1823_s21  ;;  %v1530_v31 = vsel %vm1529_vm14, %v1813_v56, %v1528_v30 }
0x1220   :  { %725 = vrot.lane.b32.xlu1 %v2213_v4, %s1824_s2  ;;  %v1439_v4 = vld [vmem:[%s2480_s5 + $0x38] sm:$0xff] }
0x1221   :  { %1460 = vmatpush.msra.mxu0 %v1439_v4  ;;  %v1563_v4 = vld [vmem:[%s2483_s6 + $0x48] sm:$0xff] }
0x1228   :  { %1050 = vrot.lane.b32.xlu1 %v2284_v2, %s1824_s2 }
0x1230   :  { %781 = vrot.lane.b32.xlu1 %v2218_v15, %s1823_s21  ;;  %v1438_v15 = vld [vmem:[%s2480_s5 + $0x30] sm:$0xff] }
0x1231   :  { %1461 = vmatpush.msra.mxu0 %v1438_v15 }
0x1233   :  { %1462 = vmatpush.msra.mxu0 %v1437_v60 }
0x1265   :  { %v1415_v5 = vpop.permute.xlu2 %1414 }
0x1266   :  { %v1417_v40 = vmul.f32 %v1415_v5, %v1412_v22  ;;  %v1557_v22 = vld [vmem:[%s2483_s6 + $0x18] sm:$0xff]  ;;  %v1556_v5 = vld [vmem:[%s2483_s6 + $0x10] sm:$0xff] }
0x1267   :  { %1582 = vmatpush.msrb.mxu3 %v1557_v22 }
0x1268   :  { %v1422_v58 = vadd.f32 %v1421_v59, %v1417_v40  ;;  %v1555_v59 = vld [vmem:[%s2483_s6 + $0x8] sm:$0xff]  ;;  %v1554_v40 = vld [vmem:[%s2483_s6] sm:$0xff] }
0x1269   :  { %1583 = vmatpush.msrb.mxu3 %v1556_v5 }
0x126a   :  { %v1423_v33 = vmul.f32 %v2029_v29, %v1422_v58  ;;  %v556_v29 = vadd.f32 %v554_v34, %v384_v11  ;;  %v1565_v58 = vld [vmem:[%s2483_s6 + $0x58] sm:$0xff] }
0x126b   :  { %1584 = vmatpush.msrb.mxu3 %v1555_v59 }
0x126c   :  { %1425 = vrot.lane.b32.xlu2 %v1423_v33, %s1823_s21  ;;  %v1564_v33 = vld [vmem:[%s2483_s6 + $0x50] sm:$0xff] }
0x126d   :  { %v1215_v0 = vpop.permute.xlu2 %1214  ;;  %1585 = vmatpush.msrb.mxu3 %v1554_v40 }
0x128a   :  { %v1372_v2 = vpop.permute.xlu1 %1371 }
0x128b   :  { %v1374_v10 = vmul.f32 %v2048_v49, %v1372_v2  ;;  %v1436_v49 = vld [vmem:[%s2480_s5 + $0x20] sm:$0xff] }
0x128c   :  { %1463 = vmatpush.msra.mxu0 %v1436_v49  ;;  %v1550_v49 = vperm.slane %v2425_v43, 1 }
0x128d   :  { %1376 = vrot.lane.b32.xlu0 %v1374_v10, %s1824_s2  ;;  %v1562_v10 = vld [vmem:[%s2483_s6 + $0x40] sm:$0xff] }
0x128e   :  { %1606 = vmatpush.msrb.mxu0 %v1565_v58 }
0x1290   :  { %1607 = vmatpush.msrb.mxu0 %v1564_v33 }
0x1292   :  { %v726_v42 = vpop.permute.xlu1 %725  ;;  %1608 = vmatpush.msrb.mxu0 %v1563_v4 }
0x1293   :  { %v728_v13 = vadd.f32 %v726_v42, %v556_v29  ;;  %v1561_v29 = vld [vmem:[%s2483_s6 + $0x38] sm:$0xff] }
0x1294   :  { %1609 = vmatpush.msrb.mxu0 %v1562_v10 }
0x1295   :  { %v883_v23 = vadd.f32 %v2240_v32, %v728_v13 }
0x1296   :  { %1610 = vmatpush.msrb.mxu0 %v1561_v29 }
0x129a   :  { %v1051_v19 = vpop.permute.xlu1 %1050 }
0x129b   :  { %v1053_v20 = vadd.f32 %v1051_v19, %v883_v23 }
0x129d   :  { %v1217_v54 = vadd.f32 %v1215_v0, %v1053_v20 }
0x12a2   :  { %v782_v25 = vpop.permute.xlu1 %781 }
0x12a3   :  { %v784_v39 = vadd.f32 %v782_v25, %v2172_v9  ;;  %v1443_v9 = vld [vmem:[%s2480_s5 + $0x58] sm:$0xff] }
0x12a4   :  { %1509 = vmatpush.msrb.mxu2 %v1443_v9 }
0x12a5   :  { %v942_v17 = vadd.f32 %v2256_v16, %v784_v39  ;;  %v1435_v16 = vld [vmem:[%s2480_s5 + $0x18] sm:$0xff] }
0x12a6   :  { %1485 = vmatpush.msrb.mxu1 %v1435_v16  ;;  %1510 = vmatpush.msrb.mxu2 %v1442_v27  ;;  %v1593_v27 = vperm.slane %v2425_v43, 4 }
0x12a7   :  { %v1110_v32 = vadd.f32 %v2297_v37, %v942_v17  ;;  %v1434_v37 = vld [vmem:[%s2480_s5 + $0x10] sm:$0xff]  ;;  %v1552_v17 = vperm.slane %v2425_v43, 2 }
0x12a8   :  { %1486 = vmatpush.msrb.mxu1 %v1434_v37 }
0x12a9   :  { %v1274_v53 = vadd.f32 %v2333_v63, %v1110_v32  ;;  %v1441_v63 = vld [vmem:[%s2480_s5 + $0x48] sm:$0xff] }
0x12aa   :  { %1511 = vmatpush.msrb.mxu2 %v1441_v63  ;;  %1487 = vmatpush.msrb.mxu1 %v1433_v62 }
0x12ac   :  { %1512 = vmatpush.msrb.mxu2 %v1440_v18  ;;  %1488 = vmatpush.msrb.mxu1 %v1432_v8 }
0x12ad   :  { %1699 = vmatmul.msk.f32.vlgmr.msrb.gmra.mxu2 %vm49_vm0, %v1493_v14 }
0x12c6   :  { %v1426_v35 = vpop.permute.xlu2 %1425 }
0x12c7   :  { %v1428_v28 = vadd.f32 %v1426_v35, %v1274_v53  ;;  %v1560_v53 = vld [vmem:[%s2483_s6 + $0x30] sm:$0xff]  ;;  %v1559_v35 = vld [vmem:[%s2483_s6 + $0x28] sm:$0xff] }
0x12c8   :  { %1611 = vmatpush.msrb.mxu0 %v1560_v53 }
0x12c9   :  { %v1431_v38 = vmul.f32 %v1811_v36, %v1428_v28  ;;  %v1558_v28 = vld [vmem:[%s2483_s6 + $0x20] sm:$0xff] }
0x12ca   :  { %1612 = vmatpush.msrb.mxu0 %v1559_v35 }
0x12cb   :  { %1697 = vmatmul.msk.f32.vlgmr.msra.gmra.mxu0 %vm49_vm0, %v1431_v38 }
0x12cc   :  { %1613 = vmatpush.msrb.mxu0 %v1558_v28 }
0x12ff   :  { %v1377_v7 = vpop.permute.xlu0 %1376 }
0x1300   :  { %v1379_v41 = vadd.f32 %v1377_v7, %v1217_v54 }
0x1302   :  { %v1430_v3 = vmul.f32 %v1811_v36, %v1379_v41  ;;  %v1566_v36 = vperm.slane %v2425_v43, 3 }
0x1304   :  { %1469 = vrot.lane.b32.xlu0 %v1430_v3, %s1823_s21  ;;  %v1618_v3 = vlaneseq }
0x1306   :  { %v1619_v9 = vand.u32 127, %v1618_v3 }
0x1308   :  { %vm1647_vm4 = vcmp.eq.s32.totalorder %v1619_v9, 2  ;;  %vm1620_vm5 = vcmp.lt.s32.totalorder %v1619_v9, 2 }
0x1330   :  { %v1514_v45 = vpop.f32.mrf.mxu2 }
0x1348   :  { %v1465_v44 = vpop.f32.mrf.mxu0 }
0x1376   :  { %v1470_v51 = vpop.permute.xlu0 %1469 }
0x1377   :  { %1698 = vmatmul.msk.f32.vlgmr.msrb.gmra.mxu1 %vm49_vm0, %v1470_v51 }
0x13f4   :  { %v1490_v12 = vpop.f32.mrf.mxu1 }
0x13f5   :  { %v1491_v47 = vadd.f32 %v1490_v12, %v1465_v44 }
0x13f7   :  { %v1517_v46 = vadd.f32 %v1514_v45, %v1491_v47 }
0x13f9   :  { %v1519_v50 = vadd.f32 %v1518_v48, %v1517_v46 }
0x13fb   :  { %v1521_v52 = vsel %vm1520_vm13, %v1519_v50, 0.0 }
0x13fc   :  { %1522 = vadd.xlane.f32.xlu1 %v1521_v52 }
0x146f   :  { %v1523_v21 = vpop.xlane.xlu1 %1522 }
0x1470   :  { %v1531_v6 = vmul.f32 %v1530_v31, %v1523_v21 }
0x1472   :  { %v1532_v34 = vsub.f32 %v1519_v50, %v1531_v6 }
0x1474   :  { %v1533_v24 = vmul.f32 %v1532_v34, %v1532_v34 }
0x1476   :  { %v1534_v1 = vsel %vm1520_vm13, %v1533_v24, 0.0 }
0x1477   :  { %1535 = vadd.xlane.f32.xlu2 %v1534_v1 }
0x14ea   :  { %v1536_v15 = vpop.xlane.xlu2 %1535 }
0x14eb   :  { %v1537_v2 = vmul.f32 %v1536_v15, %v1530_v31 }
0x14ed   :  { %v1538_v11 = vadd.f32 1e-05, %v1537_v2 }
0x14ef   :  { %1814 = vrsqrt.f32 %v1538_v11  ;;  %vm1545_vm1 = vweird.f32 %v1538_v11 }
0x14f5   :  { %v1815_v42 = vpop.eup %1814 }
0x14f6   :  { %v1540_v13 = vmul.f32 %v1815_v42, %v1538_v11  ;;  %vm1546_vm15 = vweird.f32 %v1815_v42 }
0x14f7   :  { %vm1547_vm2 = vmor %vm1545_vm1, %vm1546_vm15 }
0x14f8   :  { %v1541_v23 = vmul.f32 %v1815_v42, %v1540_v13 }
0x14fa   :  { %v1542_v19 = vmul.f32 0.5, %v1541_v23 }
0x14fc   :  { %v1543_v20 = vsub.f32 1.5, %v1542_v19 }
0x14fe   :  { %v1544_v60 = vmul.f32 %v1815_v42, %v1543_v20 }
0x1500   :  { %v1548_v25 = vsel %vm1547_vm2, %v1815_v42, %v1544_v60 }
0x1501   :  { %v1549_v39 = vmul.f32 %v1548_v25, %v1532_v34 }
0x1503   :  { %v1551_v0 = vmul.f32 %v1550_v49, %v1549_v39 }
0x1505   :  { %v1553_v32 = vadd.f32 %v1552_v17, %v1551_v0 }
0x1507   :  { %1700 = vmatmul.msk.f32.vlgmr.msrb.gmra.mxu3 %vm49_vm0, %v1553_v32 }
0x158a   :  { %v1587_v38 = vpop.f32.mrf.mxu3 }
0x158b   :  { %v1588_v54 = vadd.f32 %v1587_v38, %v1566_v36 }
0x158d   :  { %vm1590_vm0 = vcmp.ge.f32.partialorder %v1588_v54, 0.0  ;;  %v1591_v7 = vmul.f32 0.01, %v1588_v54 }
0x158f   :  { %v1592_v41 = vsel %vm1590_vm0, %v1588_v54, %v1591_v7 }
0x1590   :  { %1701 = vmatmul.msk.f32.vlgmr.msrb.gmra.mxu0 %vm1594_vm3, %v1592_v41 }
0x160d   :  { %v1615_v16 = vpop.f32.mrf.mxu0 }
0x160e   :  { %v1616_v37 = vadd.f32 %v1615_v16, %v1593_v27 }
0x1610   :  { %v1648_v63 = vsel %vm1647_vm4, %v1616_v37, 0.0  ;;  %v1621_v62 = vsel %vm1620_vm5, %v1616_v37, -1e+30 }
0x1611   :  { %v1623_v18 = vsel %vm1622_vm6, %v1621_v62, -inf }
0x1612   :  { %1624 = vmax.xlane.f32.xlu0 %v1623_v18 }
0x1685   :  { %v1625_v8 = vpop.xlane.xlu0 %1624 }
0x1686   :  { %v1626_v14 = vsub.f32 %v1621_v62, %v1625_v8 }
0x1688   :  { %v1627_v51 = vmul.f32 1.442695, %v1626_v14 }
0x168a   :  { %1816 = vpow2.f32 %v1627_v51 }
0x1690   :  { %v1817_v44 = vpop.eup %1816 }
0x1691   :  { %v1629_v12 = vsel %vm1622_vm6, %v1817_v44, 0.0 }
0x1692   :  { %1630 = vadd.xlane.f32.xlu2 %v1629_v12 }
0x1705   :  { %v1631_v45 = vpop.xlane.xlu2 %1630 }
0x1706   :  { %1818 = vrcp.f32 %v1631_v45  ;;  %v1643_v46 = vand.u32 2147483648, %v1631_v45  ;;  %v1641_v52 = vand.u32 2147483647, %v1631_v45  ;;  %vm1637_vm8 = vweird.f32 %v1631_v45 }
0x1708   :  { %v1644_v56 = vor.u32 1.1754944e-38, %v1643_v46  ;;  %vm1642_vm10 = vcmp.eq.f32.partialorder %v1641_v52, 8.507059e+37 }
0x170c   :  { %v1819_v43 = vpop.eup %1818 }
0x170d   :  { %v1633_v47 = vmul.f32 %v1819_v43, %v1631_v45  ;;  %vm1638_vm7 = vweird.f32 %v1819_v43 }
0x170e   :  { %vm1639_vm9 = vmor %vm1637_vm8, %vm1638_vm7 }
0x170f   :  { %v1634_v48 = vsub.f32 1.0, %v1633_v47 }
0x1711   :  { %v1635_v50 = vmul.f32 %v1819_v43, %v1634_v48 }
0x1713   :  { %v1636_v55 = vadd.f32 %v1819_v43, %v1635_v50 }
0x1715   :  { %v1640_v57 = vsel %vm1639_vm9, %v1819_v43, %v1636_v55 }
0x1716   :  { %v1645_v61 = vsel %vm1642_vm10, %v1644_v56, %v1640_v57 }
0x1717   :  { %v1646_v26 = vmul.f32 %v1817_v44, %v1645_v61 }
0x1719   :  { %v1649_v30 = vsel %vm1620_vm5, %v1646_v26, %v1648_v63 }
0x171a   :  { %1650 = vst [vmem:[%s2484_s8] sm:$0x3] %v1649_v30 }

</bundles_post_ra>
